<compile_context>
chip_gen: v7x
topology: tpu7x:2x2x1
jax: 0.10.0
libtpu: 0.0.40
codegen_flags: <defaults>
</compile_context>

<pallas_src>
import jax
import jax.numpy as jnp
from jax.experimental import pallas as pl
from jax.experimental.pallas import tpu as pltpu

# ---- EfficientKAN hyper-parameters (library defaults) -----------------------
GRID_SIZE = 5
SPLINE_ORDER = 3
NUM_BASES = GRID_SIZE + SPLINE_ORDER            # 8 spline bases per feature
GRID_POINTS = GRID_SIZE + 2 * SPLINE_ORDER + 1  # 12 knots per feature
RMS_EPS = 1e-12                                 # torch F.normalize eps
INV_SQRT2 = 0.7071067811865476

# Uniform knot grid on [-1, 1], extended by spline_order on each side.
# Shared by all features -> plain Python float constants (no VMEM arrays).
H_KNOT = 2.0 / GRID_SIZE
KNOTS = [m * H_KNOT - 1.0 - SPLINE_ORDER * H_KNOT for m in range(GRID_POINTS)]


# ---- math helpers (usable both inside the kernel and in the jnp reference) --
def _erf_approx(x):
    # Abramowitz & Stegun 7.1.26, |error| < 1.5e-7 (f32-level accuracy).
    a1, a2, a3, a4, a5 = 0.254829592, -0.284496736, 1.421413741, -1.453152027, 1.061405429
    p = 0.3275911
    s = jnp.where(x >= 0.0, 1.0, -1.0)
    z = jnp.abs(x)
    t = 1.0 / (1.0 + p * z)
    poly = ((((a5 * t + a4) * t + a3) * t + a2) * t + a1) * t
    return s * (1.0 - poly * jnp.exp(-z * z))


def _gelu_exact(x):
    return 0.5 * x * (1.0 + _erf_approx(x * INV_SQRT2))


def _b_splines_uniform(x):
    """Cox-de Boor recursion with compile-time-constant uniform knots.

    x: (N, in) f32.  Returns list of NUM_BASES arrays, each (N, in).

    All knot gaps equal k*h, so both divisions per basis/level collapse to a
    multiply by the constant 1/(k*h).  Additionally, because
    (g[m+k+1]-x)/(k*h) == 1 - (x-g[m+1])/(k*h), the right-hand coefficient is
    derived from the already-computed t[m+1] (one mul for u = x*inv per level,
    one sub per t, then 2 mul + 1 sub + 1 add per basis).
    """
    g = KNOTS
    # degree 0: indicator of [g[m], g[m+1]) as a difference of step functions
    step = [(x >= g[m]).astype(jnp.float32) for m in range(GRID_POINTS)]
    bases = [step[m] - step[m + 1] for m in range(GRID_POINTS - 1)]
    for k in range(1, SPLINE_ORDER + 1):
        inv = 1.0 / (k * H_KNOT)
        u = x * inv
        t = [u - g[m] * inv for m in range(len(bases))]
        bases = [t[m] * bases[m] + (1.0 - t[m + 1]) * bases[m + 1]
                 for m in range(len(bases) - 1)]
    return bases                                              # NUM_BASES x (N, in)


def _kan_linear_fused(x, w):
    """EfficientKAN KANLinear as ONE wide-K matmul.

    x: (N, in) f32
    w: ((NUM_BASES+1)*in, out) -- rows [0:in] = base weight (for silu(x)),
       rows [(1+j)*in:(2+j)*in] = spline weight of basis j (scaler folded in).
    Each LHS piece is cast to the weight dtype (bf16) before the lane concat,
    halving the concat traffic / lhs footprint; accumulation stays f32.
    """
    silu = jax.nn.silu(x)
    bases = _b_splines_uniform(x)
    lhs = jnp.concatenate(
        [p.astype(w.dtype) for p in ([silu] + bases)], axis=-1)  # (N, 9*in) bf16
    return jnp.dot(lhs, w, preferred_element_type=jnp.float32)


# ---- Pallas kernel -----------------------------------------------------------
def kan_ffn_kernel(x_ref, gamma_ref, w1_ref, w2_ref, o_ref):
    x = x_ref[...]                                            # (TN, D) f32
    gamma_scaled = gamma_ref[...]                             # (1, D), = gamma*sqrt(D)

    # RMSNorm: F.normalize(x, dim=-1) * sqrt(d) * gamma
    # (rsqrt on the EUP slot; max(ss, eps^2) keeps torch's max(||x||, eps).)
    ss = jnp.sum(x * x, axis=-1, keepdims=True)
    inv = jax.lax.rsqrt(jnp.maximum(ss, RMS_EPS * RMS_EPS))
    xn = x * inv * gamma_scaled

    # KANLinear 1: d -> 4d (single wide-K MXU call)
    h = _kan_linear_fused(xn, w1_ref[...])
    # exact (erf) GELU, as in torch nn.GELU()
    h = _gelu_exact(h)
    # TODO(synk): nn.Dropout is identity at inference; training-mode mask not implemented.
    # KANLinear 2: 4d -> d
    y = _kan_linear_fused(h, w2_ref[...])

    o_ref[...] = y.astype(o_ref.dtype)


# ---- wrapper -----------------------------------------------------------------
def _round_up(n, m):
    return pl.cdiv(n, m) * m


def kan_feedforward(x, params, *, tn=256):
    """x: (B, S, D).  Flattens to (N, D) tokens and tiles the token axis."""
    B, S, D = x.shape
    H = 4 * D
    N = B * S

    tn = int(_round_up(max(8, min(tn, _round_up(N, 8))), 8))
    n_pad = int(_round_up(N, tn))

    xf = x.reshape(N, D).astype(jnp.float32)
    if n_pad != N:
        xf = jnp.pad(xf, ((0, n_pad - N), (0, 0)))            # zero rows: harmless

    # Fold the RMSNorm sqrt(D) scale into gamma on the host (one fewer kernel op).
    gamma_scaled = (params["gamma"].astype(jnp.float32) * (D ** 0.5)).reshape(1, D)

    kd = (NUM_BASES + 1) * D                                  # K of layer 1
    kh = (NUM_BASES + 1) * H                                  # K of layer 2

    # Scoped-VMEM budget: resident weights + double-buffered x/out tiles +
    # in-kernel temporaries (f32 bases / hidden, bf16 lhs).  Capped to stay
    # valid on v7x's 64 MiB physical VMEM.
    w_bytes = sum(int(params[k].size) * params[k].dtype.itemsize for k in ("w1", "w2"))
    act_bytes = tn * (4 * (4 * D + 2 * H + 2 * D) + 2 * (kd + kh))
    vmem_limit = int(min(64 * 1024 * 1024,
                         max(32 * 1024 * 1024, 2 * (w_bytes + act_bytes))))

    # NOTE: for real workloads D (and 4D) should be multiples of 128 so the
    # output stores and the lane-concat are lane-dense; D here is dictated by
    # the module config.
    out = pl.pallas_call(
        kan_ffn_kernel,
        grid=(n_pad // tn,),
        in_specs=[
            pl.BlockSpec((tn, D), lambda i: (i, 0)),          # x tokens (tiled)
            pl.BlockSpec((1, D), lambda i: (0, 0)),           # gamma*sqrt(D) (resident)
            pl.BlockSpec((kd, H), lambda i: (0, 0)),          # fused W1 (resident)
            pl.BlockSpec((kh, D), lambda i: (0, 0)),          # fused W2 (resident)
        ],
        out_specs=pl.BlockSpec((tn, D), lambda i: (i, 0)),
        out_shape=jax.ShapeDtypeStruct((n_pad, D), x.dtype),
        compiler_params=pltpu.CompilerParams(
            dimension_semantics=("parallel",),
            vmem_limit_bytes=vmem_limit),
    )(xf, gamma_scaled, params["w1"], params["w2"])

    return out[:N].reshape(B, S, D)


def kan_feedforward_ref(x, params):
    """Pure-jnp reference (same weights, exact-erf GELU, torch-style norm)."""
    B, S, D = x.shape
    xf = x.reshape(-1, D).astype(jnp.float32)
    norm = jnp.sqrt(jnp.sum(xf * xf, axis=-1, keepdims=True))
    xn = xf / jnp.maximum(norm, RMS_EPS) * (D ** 0.5) * params["gamma"]
    h = _kan_linear_fused(xn, params["w1"])
    h = jax.nn.gelu(h, approximate=False)
    y = _kan_linear_fused(h, params["w2"])
    return y.reshape(B, S, D).astype(x.dtype)


# ---- deterministic parameter construction ------------------------------------
def make_params(dim, key, weight_dtype=jnp.bfloat16):
    hidden = 4 * dim
    k = jax.random.split(key, 6)

    gamma = jnp.ones((1, dim), jnp.float32)                   # RMSNorm gamma

    # base weights, pre-transposed to (in, out)
    bw1 = jax.random.normal(k[0], (dim, hidden), jnp.float32) / (dim ** 0.5)
    bw2 = jax.random.normal(k[1], (hidden, dim), jnp.float32) / (hidden ** 0.5)

    # spline weights (out, in, NUM_BASES) with standalone scaler (out, in),
    # folded together, transposed to (NUM_BASES, in, out) and flattened to
    # (NUM_BASES*in, out).
    sw1 = jax.random.normal(k[2], (hidden, dim, NUM_BASES), jnp.float32) * 0.1
    sc1 = jax.random.normal(k[3], (hidden, dim), jnp.float32) / (dim ** 0.5)
    sw1 = jnp.transpose(sw1 * sc1[:, :, None], (2, 1, 0)).reshape(NUM_BASES * dim, hidden)

    sw2 = jax.random.normal(k[4], (dim, hidden, NUM_BASES), jnp.float32) * 0.1
    sc2 = jax.random.normal(k[5], (dim, hidden), jnp.float32) / (hidden ** 0.5)
    sw2 = jnp.transpose(sw2 * sc2[:, :, None], (2, 1, 0)).reshape(NUM_BASES * hidden, dim)

    # fused weights for the single wide-K matmul, stored bf16 (f32 accumulation)
    w1 = jnp.concatenate([bw1, sw1], axis=0).astype(weight_dtype)   # (9*dim, hidden)
    w2 = jnp.concatenate([bw2, sw2], axis=0).astype(weight_dtype)   # (9*hidden, dim)

    return dict(gamma=gamma, w1=w1, w2=w2)


if __name__ == "__main__":
    B, S, D = 2, 8, 8     # batch=2, seq=8, dim=8 (hidden = 4*dim = 32)
    key = jax.random.PRNGKey(0)
    kx, kp = jax.random.split(key)
    x = jax.random.normal(kx, (B, S, D), jnp.float32)
    params = make_params(D, kp)

    # tn=8 gives grid=(2,) at this tiny shape so the tiled path is exercised;
    # at realistic N the default tn=256 applies.
    y = kan_feedforward(x, params, tn=8)
    jax.block_until_ready(y)

    y_ref = kan_feedforward_ref(x, params)
    assert y.shape == x.shape
    assert jnp.allclose(y, y_ref, rtol=1e-3, atol=5e-3), \
        f"kernel/reference mismatch, max abs err = {jnp.max(jnp.abs(y - y_ref))}"
    print("KERNEL_OK")
</pallas_src>

<mosaic_0001>
module attributes {stable_mosaic.version = 11 : i64} {
  func.func @kan_ffn_kernel(%arg0: i32, %arg1: memref<8x8xf32, #tpu.memory_space<vmem>>, %arg2: memref<1x8xf32, #tpu.memory_space<vmem>>, %arg3: memref<72x32xbf16, #tpu.memory_space<vmem>>, %arg4: memref<288x8xbf16, #tpu.memory_space<vmem>>, %arg5: memref<8x8xf32, #tpu.memory_space<vmem>>) attributes {dimension_semantics = [#tpu.dimension_semantics<parallel>], iteration_bounds = array<i64: 2>, scalar_prefetch = 0 : i64, scratch_operands = 0 : i64, tpu.core_type = #tpu.core_type<tc>, window_params = [{transform_indices = @transform_0, window_bounds = array<i64: 8, 8>}, {pipeline_mode = #tpu.pipeline_mode<synchronous>, transform_indices = @transform_1, window_bounds = array<i64: 1, 8>}, {pipeline_mode = #tpu.pipeline_mode<synchronous>, transform_indices = @transform_2, window_bounds = array<i64: 72, 32>}, {pipeline_mode = #tpu.pipeline_mode<synchronous>, transform_indices = @transform_3, window_bounds = array<i64: 288, 8>}, {transform_indices = @transform_4, window_bounds = array<i64: 8, 8>}]} {
    %c0 = arith.constant 0 : index
    %c0_0 = arith.constant 0 : index
    %0 = vector.load %arg1[%c0, %c0_0] : memref<8x8xf32, #tpu.memory_space<vmem>>, vector<8x8xf32>
    %c0_1 = arith.constant 0 : index
    %c0_2 = arith.constant 0 : index
    %1 = vector.load %arg2[%c0_1, %c0_2] : memref<1x8xf32, #tpu.memory_space<vmem>>, vector<1x8xf32>
    %2 = arith.mulf %0, %0 : vector<8x8xf32>
    %cst = arith.constant dense<0.000000e+00> : vector<8xf32>
    %3 = vector.multi_reduction <add>, %2, %cst [1] : vector<8x8xf32> to vector<8xf32>
    %4 = vector.shape_cast %3 : vector<8xf32> to vector<8x1xf32>
    %cst_3 = arith.constant 1.000000e-24 : f32
    %5 = vector.broadcast %cst_3 : f32 to vector<8x1xf32>
    %6 = arith.maximumf %4, %5 : vector<8x1xf32>
    %7 = math.rsqrt %6 : vector<8x1xf32>
    %8 = vector.broadcast %7 : vector<8x1xf32> to vector<8x8xf32>
    %9 = arith.mulf %0, %8 : vector<8x8xf32>
    %10 = vector.broadcast %1 : vector<1x8xf32> to vector<8x8xf32>
    %11 = arith.mulf %9, %10 : vector<8x8xf32>
    %c0_4 = arith.constant 0 : index
    %c0_5 = arith.constant 0 : index
    %12 = vector.load %arg3[%c0_4, %c0_5] : memref<72x32xbf16, #tpu.memory_space<vmem>>, vector<72x32xbf16>
    %13 = arith.negf %11 : vector<8x8xf32>
    %14 = math.exp %13 : vector<8x8xf32>
    %cst_6 = arith.constant 1.000000e+00 : f32
    %15 = vector.broadcast %cst_6 : f32 to vector<8x8xf32>
    %16 = arith.addf %15, %14 : vector<8x8xf32>
    %17 = arith.divf %15, %16 : vector<8x8xf32>
    %18 = arith.mulf %11, %17 : vector<8x8xf32>
    %cst_7 = arith.constant -2.200000e+00 : f32
    %19 = vector.broadcast %cst_7 : f32 to vector<8x8xf32>
    %20 = arith.cmpf oge, %11, %19 : vector<8x8xf32>
    %21 = arith.extui %20 : vector<8x8xi1> to vector<8x8xi32>
    %22 = arith.sitofp %21 : vector<8x8xi32> to vector<8x8xf32>
    %cst_8 = arith.constant -1.800000e+00 : f32
    %23 = vector.broadcast %cst_8 : f32 to vector<8x8xf32>
    %24 = arith.cmpf oge, %11, %23 : vector<8x8xf32>
    %25 = arith.extui %24 : vector<8x8xi1> to vector<8x8xi32>
    %26 = arith.sitofp %25 : vector<8x8xi32> to vector<8x8xf32>
    %cst_9 = arith.constant -1.400000e+00 : f32
    %27 = vector.broadcast %cst_9 : f32 to vector<8x8xf32>
    %28 = arith.cmpf oge, %11, %27 : vector<8x8xf32>
    %29 = arith.extui %28 : vector<8x8xi1> to vector<8x8xi32>
    %30 = arith.sitofp %29 : vector<8x8xi32> to vector<8x8xf32>
    %cst_10 = arith.constant -1.000000e+00 : f32
    %31 = vector.broadcast %cst_10 : f32 to vector<8x8xf32>
    %32 = arith.cmpf oge, %11, %31 : vector<8x8xf32>
    %33 = arith.extui %32 : vector<8x8xi1> to vector<8x8xi32>
    %34 = arith.sitofp %33 : vector<8x8xi32> to vector<8x8xf32>
    %cst_11 = arith.constant -6.000000e-01 : f32
    %35 = vector.broadcast %cst_11 : f32 to vector<8x8xf32>
    %36 = arith.cmpf oge, %11, %35 : vector<8x8xf32>
    %37 = arith.extui %36 : vector<8x8xi1> to vector<8x8xi32>
    %38 = arith.sitofp %37 : vector<8x8xi32> to vector<8x8xf32>
    %cst_12 = arith.constant -2.000000e-01 : f32
    %39 = vector.broadcast %cst_12 : f32 to vector<8x8xf32>
    %40 = arith.cmpf oge, %11, %39 : vector<8x8xf32>
    %41 = arith.extui %40 : vector<8x8xi1> to vector<8x8xi32>
    %42 = arith.sitofp %41 : vector<8x8xi32> to vector<8x8xf32>
    %cst_13 = arith.constant 2.000000e-01 : f32
    %43 = vector.broadcast %cst_13 : f32 to vector<8x8xf32>
    %44 = arith.cmpf oge, %11, %43 : vector<8x8xf32>
    %45 = arith.extui %44 : vector<8x8xi1> to vector<8x8xi32>
    %46 = arith.sitofp %45 : vector<8x8xi32> to vector<8x8xf32>
    %cst_14 = arith.constant 6.000000e-01 : f32
    %47 = vector.broadcast %cst_14 : f32 to vector<8x8xf32>
    %48 = arith.cmpf oge, %11, %47 : vector<8x8xf32>
    %49 = arith.extui %48 : vector<8x8xi1> to vector<8x8xi32>
    %50 = arith.sitofp %49 : vector<8x8xi32> to vector<8x8xf32>
    %cst_15 = arith.constant 1.000000e+00 : f32
    %51 = vector.broadcast %cst_15 : f32 to vector<8x8xf32>
    %52 = arith.cmpf oge, %11, %51 : vector<8x8xf32>
    %53 = arith.extui %52 : vector<8x8xi1> to vector<8x8xi32>
    %54 = arith.sitofp %53 : vector<8x8xi32> to vector<8x8xf32>
    %cst_16 = arith.constant 1.400000e+00 : f32
    %55 = vector.broadcast %cst_16 : f32 to vector<8x8xf32>
    %56 = arith.cmpf oge, %11, %55 : vector<8x8xf32>
    %57 = arith.extui %56 : vector<8x8xi1> to vector<8x8xi32>
    %58 = arith.sitofp %57 : vector<8x8xi32> to vector<8x8xf32>
    %cst_17 = arith.constant 1.800000e+00 : f32
    %59 = vector.broadcast %cst_17 : f32 to vector<8x8xf32>
    %60 = arith.cmpf oge, %11, %59 : vector<8x8xf32>
    %61 = arith.extui %60 : vector<8x8xi1> to vector<8x8xi32>
    %62 = arith.sitofp %61 : vector<8x8xi32> to vector<8x8xf32>
    %cst_18 = arith.constant 2.200000e+00 : f32
    %63 = vector.broadcast %cst_18 : f32 to vector<8x8xf32>
    %64 = arith.cmpf oge, %11, %63 : vector<8x8xf32>
    %65 = arith.extui %64 : vector<8x8xi1> to vector<8x8xi32>
    %66 = arith.sitofp %65 : vector<8x8xi32> to vector<8x8xf32>
    %67 = arith.subf %22, %26 : vector<8x8xf32>
    %68 = arith.subf %26, %30 : vector<8x8xf32>
    %69 = arith.subf %30, %34 : vector<8x8xf32>
    %70 = arith.subf %34, %38 : vector<8x8xf32>
    %71 = arith.subf %38, %42 : vector<8x8xf32>
    %72 = arith.subf %42, %46 : vector<8x8xf32>
    %73 = arith.subf %46, %50 : vector<8x8xf32>
    %74 = arith.subf %50, %54 : vector<8x8xf32>
    %75 = arith.subf %54, %58 : vector<8x8xf32>
    %76 = arith.subf %58, %62 : vector<8x8xf32>
    %77 = arith.subf %62, %66 : vector<8x8xf32>
    %cst_19 = arith.constant 2.500000e+00 : f32
    %78 = vector.broadcast %cst_19 : f32 to vector<8x8xf32>
    %79 = arith.mulf %11, %78 : vector<8x8xf32>
    %cst_20 = arith.constant -5.500000e+00 : f32
    %80 = vector.broadcast %cst_20 : f32 to vector<8x8xf32>
    %81 = arith.subf %79, %80 : vector<8x8xf32>
    %cst_21 = arith.constant -4.500000e+00 : f32
    %82 = vector.broadcast %cst_21 : f32 to vector<8x8xf32>
    %83 = arith.subf %79, %82 : vector<8x8xf32>
    %cst_22 = arith.constant -3.500000e+00 : f32
    %84 = vector.broadcast %cst_22 : f32 to vector<8x8xf32>
    %85 = arith.subf %79, %84 : vector<8x8xf32>
    %cst_23 = arith.constant -2.500000e+00 : f32
    %86 = vector.broadcast %cst_23 : f32 to vector<8x8xf32>
    %87 = arith.subf %79, %86 : vector<8x8xf32>
    %cst_24 = arith.constant -1.500000e+00 : f32
    %88 = vector.broadcast %cst_24 : f32 to vector<8x8xf32>
    %89 = arith.subf %79, %88 : vector<8x8xf32>
    %cst_25 = arith.constant -5.000000e-01 : f32
    %90 = vector.broadcast %cst_25 : f32 to vector<8x8xf32>
    %91 = arith.subf %79, %90 : vector<8x8xf32>
    %cst_26 = arith.constant 5.000000e-01 : f32
    %92 = vector.broadcast %cst_26 : f32 to vector<8x8xf32>
    %93 = arith.subf %79, %92 : vector<8x8xf32>
    %cst_27 = arith.constant 1.500000e+00 : f32
    %94 = vector.broadcast %cst_27 : f32 to vector<8x8xf32>
    %95 = arith.subf %79, %94 : vector<8x8xf32>
    %cst_28 = arith.constant 2.500000e+00 : f32
    %96 = vector.broadcast %cst_28 : f32 to vector<8x8xf32>
    %97 = arith.subf %79, %96 : vector<8x8xf32>
    %cst_29 = arith.constant 3.500000e+00 : f32
    %98 = vector.broadcast %cst_29 : f32 to vector<8x8xf32>
    %99 = arith.subf %79, %98 : vector<8x8xf32>
    %cst_30 = arith.constant 4.500000e+00 : f32
    %100 = vector.broadcast %cst_30 : f32 to vector<8x8xf32>
    %101 = arith.subf %79, %100 : vector<8x8xf32>
    %102 = arith.mulf %81, %67 : vector<8x8xf32>
    %cst_31 = arith.constant 1.000000e+00 : f32
    %103 = vector.broadcast %cst_31 : f32 to vector<8x8xf32>
    %104 = arith.subf %103, %83 : vector<8x8xf32>
    %105 = arith.mulf %104, %68 : vector<8x8xf32>
    %106 = arith.addf %102, %105 : vector<8x8xf32>
    %107 = arith.mulf %83, %68 : vector<8x8xf32>
    %cst_32 = arith.constant 1.000000e+00 : f32
    %108 = vector.broadcast %cst_32 : f32 to vector<8x8xf32>
    %109 = arith.subf %108, %85 : vector<8x8xf32>
    %110 = arith.mulf %109, %69 : vector<8x8xf32>
    %111 = arith.addf %107, %110 : vector<8x8xf32>
    %112 = arith.mulf %85, %69 : vector<8x8xf32>
    %cst_33 = arith.constant 1.000000e+00 : f32
    %113 = vector.broadcast %cst_33 : f32 to vector<8x8xf32>
    %114 = arith.subf %113, %87 : vector<8x8xf32>
    %115 = arith.mulf %114, %70 : vector<8x8xf32>
    %116 = arith.addf %112, %115 : vector<8x8xf32>
    %117 = arith.mulf %87, %70 : vector<8x8xf32>
    %cst_34 = arith.constant 1.000000e+00 : f32
    %118 = vector.broadcast %cst_34 : f32 to vector<8x8xf32>
    %119 = arith.subf %118, %89 : vector<8x8xf32>
    %120 = arith.mulf %119, %71 : vector<8x8xf32>
    %121 = arith.addf %117, %120 : vector<8x8xf32>
    %122 = arith.mulf %89, %71 : vector<8x8xf32>
    %cst_35 = arith.constant 1.000000e+00 : f32
    %123 = vector.broadcast %cst_35 : f32 to vector<8x8xf32>
    %124 = arith.subf %123, %91 : vector<8x8xf32>
    %125 = arith.mulf %124, %72 : vector<8x8xf32>
    %126 = arith.addf %122, %125 : vector<8x8xf32>
    %127 = arith.mulf %91, %72 : vector<8x8xf32>
    %cst_36 = arith.constant 1.000000e+00 : f32
    %128 = vector.broadcast %cst_36 : f32 to vector<8x8xf32>
    %129 = arith.subf %128, %93 : vector<8x8xf32>
    %130 = arith.mulf %129, %73 : vector<8x8xf32>
    %131 = arith.addf %127, %130 : vector<8x8xf32>
    %132 = arith.mulf %93, %73 : vector<8x8xf32>
    %cst_37 = arith.constant 1.000000e+00 : f32
    %133 = vector.broadcast %cst_37 : f32 to vector<8x8xf32>
    %134 = arith.subf %133, %95 : vector<8x8xf32>
    %135 = arith.mulf %134, %74 : vector<8x8xf32>
    %136 = arith.addf %132, %135 : vector<8x8xf32>
    %137 = arith.mulf %95, %74 : vector<8x8xf32>
    %cst_38 = arith.constant 1.000000e+00 : f32
    %138 = vector.broadcast %cst_38 : f32 to vector<8x8xf32>
    %139 = arith.subf %138, %97 : vector<8x8xf32>
    %140 = arith.mulf %139, %75 : vector<8x8xf32>
    %141 = arith.addf %137, %140 : vector<8x8xf32>
    %142 = arith.mulf %97, %75 : vector<8x8xf32>
    %cst_39 = arith.constant 1.000000e+00 : f32
    %143 = vector.broadcast %cst_39 : f32 to vector<8x8xf32>
    %144 = arith.subf %143, %99 : vector<8x8xf32>
    %145 = arith.mulf %144, %76 : vector<8x8xf32>
    %146 = arith.addf %142, %145 : vector<8x8xf32>
    %147 = arith.mulf %99, %76 : vector<8x8xf32>
    %cst_40 = arith.constant 1.000000e+00 : f32
    %148 = vector.broadcast %cst_40 : f32 to vector<8x8xf32>
    %149 = arith.subf %148, %101 : vector<8x8xf32>
    %150 = arith.mulf %149, %77 : vector<8x8xf32>
    %151 = arith.addf %147, %150 : vector<8x8xf32>
    %cst_41 = arith.constant 1.250000e+00 : f32
    %152 = vector.broadcast %cst_41 : f32 to vector<8x8xf32>
    %153 = arith.mulf %11, %152 : vector<8x8xf32>
    %cst_42 = arith.constant -2.750000e+00 : f32
    %154 = vector.broadcast %cst_42 : f32 to vector<8x8xf32>
    %155 = arith.subf %153, %154 : vector<8x8xf32>
    %cst_43 = arith.constant -2.250000e+00 : f32
    %156 = vector.broadcast %cst_43 : f32 to vector<8x8xf32>
    %157 = arith.subf %153, %156 : vector<8x8xf32>
    %cst_44 = arith.constant -1.750000e+00 : f32
    %158 = vector.broadcast %cst_44 : f32 to vector<8x8xf32>
    %159 = arith.subf %153, %158 : vector<8x8xf32>
    %cst_45 = arith.constant -1.250000e+00 : f32
    %160 = vector.broadcast %cst_45 : f32 to vector<8x8xf32>
    %161 = arith.subf %153, %160 : vector<8x8xf32>
    %cst_46 = arith.constant -7.500000e-01 : f32
    %162 = vector.broadcast %cst_46 : f32 to vector<8x8xf32>
    %163 = arith.subf %153, %162 : vector<8x8xf32>
    %cst_47 = arith.constant -2.500000e-01 : f32
    %164 = vector.broadcast %cst_47 : f32 to vector<8x8xf32>
    %165 = arith.subf %153, %164 : vector<8x8xf32>
    %cst_48 = arith.constant 2.500000e-01 : f32
    %166 = vector.broadcast %cst_48 : f32 to vector<8x8xf32>
    %167 = arith.subf %153, %166 : vector<8x8xf32>
    %cst_49 = arith.constant 7.500000e-01 : f32
    %168 = vector.broadcast %cst_49 : f32 to vector<8x8xf32>
    %169 = arith.subf %153, %168 : vector<8x8xf32>
    %cst_50 = arith.constant 1.250000e+00 : f32
    %170 = vector.broadcast %cst_50 : f32 to vector<8x8xf32>
    %171 = arith.subf %153, %170 : vector<8x8xf32>
    %cst_51 = arith.constant 1.750000e+00 : f32
    %172 = vector.broadcast %cst_51 : f32 to vector<8x8xf32>
    %173 = arith.subf %153, %172 : vector<8x8xf32>
    %174 = arith.mulf %155, %106 : vector<8x8xf32>
    %cst_52 = arith.constant 1.000000e+00 : f32
    %175 = vector.broadcast %cst_52 : f32 to vector<8x8xf32>
    %176 = arith.subf %175, %157 : vector<8x8xf32>
    %177 = arith.mulf %176, %111 : vector<8x8xf32>
    %178 = arith.addf %174, %177 : vector<8x8xf32>
    %179 = arith.mulf %157, %111 : vector<8x8xf32>
    %cst_53 = arith.constant 1.000000e+00 : f32
    %180 = vector.broadcast %cst_53 : f32 to vector<8x8xf32>
    %181 = arith.subf %180, %159 : vector<8x8xf32>
    %182 = arith.mulf %181, %116 : vector<8x8xf32>
    %183 = arith.addf %179, %182 : vector<8x8xf32>
    %184 = arith.mulf %159, %116 : vector<8x8xf32>
    %cst_54 = arith.constant 1.000000e+00 : f32
    %185 = vector.broadcast %cst_54 : f32 to vector<8x8xf32>
    %186 = arith.subf %185, %161 : vector<8x8xf32>
    %187 = arith.mulf %186, %121 : vector<8x8xf32>
    %188 = arith.addf %184, %187 : vector<8x8xf32>
    %189 = arith.mulf %161, %121 : vector<8x8xf32>
    %cst_55 = arith.constant 1.000000e+00 : f32
    %190 = vector.broadcast %cst_55 : f32 to vector<8x8xf32>
    %191 = arith.subf %190, %163 : vector<8x8xf32>
    %192 = arith.mulf %191, %126 : vector<8x8xf32>
    %193 = arith.addf %189, %192 : vector<8x8xf32>
    %194 = arith.mulf %163, %126 : vector<8x8xf32>
    %cst_56 = arith.constant 1.000000e+00 : f32
    %195 = vector.broadcast %cst_56 : f32 to vector<8x8xf32>
    %196 = arith.subf %195, %165 : vector<8x8xf32>
    %197 = arith.mulf %196, %131 : vector<8x8xf32>
    %198 = arith.addf %194, %197 : vector<8x8xf32>
    %199 = arith.mulf %165, %131 : vector<8x8xf32>
    %cst_57 = arith.constant 1.000000e+00 : f32
    %200 = vector.broadcast %cst_57 : f32 to vector<8x8xf32>
    %201 = arith.subf %200, %167 : vector<8x8xf32>
    %202 = arith.mulf %201, %136 : vector<8x8xf32>
    %203 = arith.addf %199, %202 : vector<8x8xf32>
    %204 = arith.mulf %167, %136 : vector<8x8xf32>
    %cst_58 = arith.constant 1.000000e+00 : f32
    %205 = vector.broadcast %cst_58 : f32 to vector<8x8xf32>
    %206 = arith.subf %205, %169 : vector<8x8xf32>
    %207 = arith.mulf %206, %141 : vector<8x8xf32>
    %208 = arith.addf %204, %207 : vector<8x8xf32>
    %209 = arith.mulf %169, %141 : vector<8x8xf32>
    %cst_59 = arith.constant 1.000000e+00 : f32
    %210 = vector.broadcast %cst_59 : f32 to vector<8x8xf32>
    %211 = arith.subf %210, %171 : vector<8x8xf32>
    %212 = arith.mulf %211, %146 : vector<8x8xf32>
    %213 = arith.addf %209, %212 : vector<8x8xf32>
    %214 = arith.mulf %171, %146 : vector<8x8xf32>
    %cst_60 = arith.constant 1.000000e+00 : f32
    %215 = vector.broadcast %cst_60 : f32 to vector<8x8xf32>
    %216 = arith.subf %215, %173 : vector<8x8xf32>
    %217 = arith.mulf %216, %151 : vector<8x8xf32>
    %218 = arith.addf %214, %217 : vector<8x8xf32>
    %cst_61 = arith.constant 0.833333313 : f32
    %219 = vector.broadcast %cst_61 : f32 to vector<8x8xf32>
    %220 = arith.mulf %11, %219 : vector<8x8xf32>
    %cst_62 = arith.constant -1.83333337 : f32
    %221 = vector.broadcast %cst_62 : f32 to vector<8x8xf32>
    %222 = arith.subf %220, %221 : vector<8x8xf32>
    %cst_63 = arith.constant -1.500000e+00 : f32
    %223 = vector.broadcast %cst_63 : f32 to vector<8x8xf32>
    %224 = arith.subf %220, %223 : vector<8x8xf32>
    %cst_64 = arith.constant -1.16666663 : f32
    %225 = vector.broadcast %cst_64 : f32 to vector<8x8xf32>
    %226 = arith.subf %220, %225 : vector<8x8xf32>
    %cst_65 = arith.constant -0.833333313 : f32
    %227 = vector.broadcast %cst_65 : f32 to vector<8x8xf32>
    %228 = arith.subf %220, %227 : vector<8x8xf32>
    %cst_66 = arith.constant -5.000000e-01 : f32
    %229 = vector.broadcast %cst_66 : f32 to vector<8x8xf32>
    %230 = arith.subf %220, %229 : vector<8x8xf32>
    %cst_67 = arith.constant -0.166666672 : f32
    %231 = vector.broadcast %cst_67 : f32 to vector<8x8xf32>
    %232 = arith.subf %220, %231 : vector<8x8xf32>
    %cst_68 = arith.constant 0.166666672 : f32
    %233 = vector.broadcast %cst_68 : f32 to vector<8x8xf32>
    %234 = arith.subf %220, %233 : vector<8x8xf32>
    %cst_69 = arith.constant 5.000000e-01 : f32
    %235 = vector.broadcast %cst_69 : f32 to vector<8x8xf32>
    %236 = arith.subf %220, %235 : vector<8x8xf32>
    %cst_70 = arith.constant 0.833333313 : f32
    %237 = vector.broadcast %cst_70 : f32 to vector<8x8xf32>
    %238 = arith.subf %220, %237 : vector<8x8xf32>
    %239 = arith.mulf %222, %178 : vector<8x8xf32>
    %cst_71 = arith.constant 1.000000e+00 : f32
    %240 = vector.broadcast %cst_71 : f32 to vector<8x8xf32>
    %241 = arith.subf %240, %224 : vector<8x8xf32>
    %242 = arith.mulf %241, %183 : vector<8x8xf32>
    %243 = arith.addf %239, %242 : vector<8x8xf32>
    %244 = arith.mulf %224, %183 : vector<8x8xf32>
    %cst_72 = arith.constant 1.000000e+00 : f32
    %245 = vector.broadcast %cst_72 : f32 to vector<8x8xf32>
    %246 = arith.subf %245, %226 : vector<8x8xf32>
    %247 = arith.mulf %246, %188 : vector<8x8xf32>
    %248 = arith.addf %244, %247 : vector<8x8xf32>
    %249 = arith.mulf %226, %188 : vector<8x8xf32>
    %cst_73 = arith.constant 1.000000e+00 : f32
    %250 = vector.broadcast %cst_73 : f32 to vector<8x8xf32>
    %251 = arith.subf %250, %228 : vector<8x8xf32>
    %252 = arith.mulf %251, %193 : vector<8x8xf32>
    %253 = arith.addf %249, %252 : vector<8x8xf32>
    %254 = arith.mulf %228, %193 : vector<8x8xf32>
    %cst_74 = arith.constant 1.000000e+00 : f32
    %255 = vector.broadcast %cst_74 : f32 to vector<8x8xf32>
    %256 = arith.subf %255, %230 : vector<8x8xf32>
    %257 = arith.mulf %256, %198 : vector<8x8xf32>
    %258 = arith.addf %254, %257 : vector<8x8xf32>
    %259 = arith.mulf %230, %198 : vector<8x8xf32>
    %cst_75 = arith.constant 1.000000e+00 : f32
    %260 = vector.broadcast %cst_75 : f32 to vector<8x8xf32>
    %261 = arith.subf %260, %232 : vector<8x8xf32>
    %262 = arith.mulf %261, %203 : vector<8x8xf32>
    %263 = arith.addf %259, %262 : vector<8x8xf32>
    %264 = arith.mulf %232, %203 : vector<8x8xf32>
    %cst_76 = arith.constant 1.000000e+00 : f32
    %265 = vector.broadcast %cst_76 : f32 to vector<8x8xf32>
    %266 = arith.subf %265, %234 : vector<8x8xf32>
    %267 = arith.mulf %266, %208 : vector<8x8xf32>
    %268 = arith.addf %264, %267 : vector<8x8xf32>
    %269 = arith.mulf %234, %208 : vector<8x8xf32>
    %cst_77 = arith.constant 1.000000e+00 : f32
    %270 = vector.broadcast %cst_77 : f32 to vector<8x8xf32>
    %271 = arith.subf %270, %236 : vector<8x8xf32>
    %272 = arith.mulf %271, %213 : vector<8x8xf32>
    %273 = arith.addf %269, %272 : vector<8x8xf32>
    %274 = arith.mulf %236, %213 : vector<8x8xf32>
    %cst_78 = arith.constant 1.000000e+00 : f32
    %275 = vector.broadcast %cst_78 : f32 to vector<8x8xf32>
    %276 = arith.subf %275, %238 : vector<8x8xf32>
    %277 = arith.mulf %276, %218 : vector<8x8xf32>
    %278 = arith.addf %274, %277 : vector<8x8xf32>
    %279 = arith.truncf %18 : vector<8x8xf32> to vector<8x8xbf16>
    %280 = arith.truncf %243 : vector<8x8xf32> to vector<8x8xbf16>
    %281 = arith.truncf %248 : vector<8x8xf32> to vector<8x8xbf16>
    %282 = arith.truncf %253 : vector<8x8xf32> to vector<8x8xbf16>
    %283 = arith.truncf %258 : vector<8x8xf32> to vector<8x8xbf16>
    %284 = arith.truncf %263 : vector<8x8xf32> to vector<8x8xbf16>
    %285 = arith.truncf %268 : vector<8x8xf32> to vector<8x8xbf16>
    %286 = arith.truncf %273 : vector<8x8xf32> to vector<8x8xbf16>
    %287 = arith.truncf %278 : vector<8x8xf32> to vector<8x8xbf16>
    %288 = tpu.concatenate %279, %280, %281, %282, %283, %284, %285, %286, %287 in 1 : vector<8x8xbf16>, vector<8x8xbf16>, vector<8x8xbf16>, vector<8x8xbf16>, vector<8x8xbf16>, vector<8x8xbf16>, vector<8x8xbf16>, vector<8x8xbf16>, vector<8x8xbf16> -> vector<8x72xbf16>
    %cst_79 = arith.constant dense<0.000000e+00> : vector<8x32xf32>
    %289 = tpu.matmul %288, %12, %cst_79 {dimension_numbers = #tpu.dot_dimension_numbers<[1], [0], [0], [1], [0, 0, 1, 1], [], []>} : vector<8x72xbf16>, vector<72x32xbf16>, vector<8x32xf32> -> vector<8x32xf32>
    %cst_80 = arith.constant 5.000000e-01 : f32
    %290 = vector.broadcast %cst_80 : f32 to vector<8x32xf32>
    %291 = arith.mulf %290, %289 : vector<8x32xf32>
    %cst_81 = arith.constant 0.707106769 : f32
    %292 = vector.broadcast %cst_81 : f32 to vector<8x32xf32>
    %293 = arith.mulf %289, %292 : vector<8x32xf32>
    %cst_82 = arith.constant 0.000000e+00 : f32
    %294 = vector.broadcast %cst_82 : f32 to vector<8x32xf32>
    %295 = arith.cmpf oge, %293, %294 : vector<8x32xf32>
    %cst_83 = arith.constant 1.000000e+00 : f32
    %cst_84 = arith.constant -1.000000e+00 : f32
    %296 = vector.broadcast %cst_83 : f32 to vector<8x32xf32>
    %297 = vector.broadcast %cst_84 : f32 to vector<8x32xf32>
    %298 = arith.select %295, %296, %297 : vector<8x32xi1>, vector<8x32xf32>
    %299 = math.absf %293 : vector<8x32xf32>
    %cst_85 = arith.constant 0.327591091 : f32
    %300 = vector.broadcast %cst_85 : f32 to vector<8x32xf32>
    %301 = arith.mulf %300, %299 : vector<8x32xf32>
    %cst_86 = arith.constant 1.000000e+00 : f32
    %302 = vector.broadcast %cst_86 : f32 to vector<8x32xf32>
    %303 = arith.addf %302, %301 : vector<8x32xf32>
    %cst_87 = arith.constant 1.000000e+00 : f32
    %304 = vector.broadcast %cst_87 : f32 to vector<8x32xf32>
    %305 = arith.divf %304, %303 : vector<8x32xf32>
    %cst_88 = arith.constant 1.06140542 : f32
    %306 = vector.broadcast %cst_88 : f32 to vector<8x32xf32>
    %307 = arith.mulf %306, %305 : vector<8x32xf32>
    %cst_89 = arith.constant -1.45315206 : f32
    %308 = vector.broadcast %cst_89 : f32 to vector<8x32xf32>
    %309 = arith.addf %307, %308 : vector<8x32xf32>
    %310 = arith.mulf %309, %305 : vector<8x32xf32>
    %cst_90 = arith.constant 1.42141378 : f32
    %311 = vector.broadcast %cst_90 : f32 to vector<8x32xf32>
    %312 = arith.addf %310, %311 : vector<8x32xf32>
    %313 = arith.mulf %312, %305 : vector<8x32xf32>
    %cst_91 = arith.constant -0.284496725 : f32
    %314 = vector.broadcast %cst_91 : f32 to vector<8x32xf32>
    %315 = arith.addf %313, %314 : vector<8x32xf32>
    %316 = arith.mulf %315, %305 : vector<8x32xf32>
    %cst_92 = arith.constant 0.254829586 : f32
    %317 = vector.broadcast %cst_92 : f32 to vector<8x32xf32>
    %318 = arith.addf %316, %317 : vector<8x32xf32>
    %319 = arith.mulf %318, %305 : vector<8x32xf32>
    %cst_93 = arith.constant 0.000000e+00 : f32
    %320 = vector.broadcast %cst_93 : f32 to vector<8x32xf32>
    %321 = arith.subf %320, %299 : vector<8x32xf32>
    %322 = arith.mulf %321, %299 : vector<8x32xf32>
    %323 = math.exp %322 : vector<8x32xf32>
    %324 = arith.mulf %319, %323 : vector<8x32xf32>
    %cst_94 = arith.constant 1.000000e+00 : f32
    %325 = vector.broadcast %cst_94 : f32 to vector<8x32xf32>
    %326 = arith.subf %325, %324 : vector<8x32xf32>
    %327 = arith.mulf %298, %326 : vector<8x32xf32>
    %cst_95 = arith.constant 1.000000e+00 : f32
    %328 = vector.broadcast %cst_95 : f32 to vector<8x32xf32>
    %329 = arith.addf %328, %327 : vector<8x32xf32>
    %330 = arith.mulf %291, %329 : vector<8x32xf32>
    %c0_96 = arith.constant 0 : index
    %c0_97 = arith.constant 0 : index
    %331 = vector.load %arg4[%c0_96, %c0_97] : memref<288x8xbf16, #tpu.memory_space<vmem>>, vector<288x8xbf16>
    %332 = arith.negf %330 : vector<8x32xf32>
    %333 = math.exp %332 : vector<8x32xf32>
    %cst_98 = arith.constant 1.000000e+00 : f32
    %334 = vector.broadcast %cst_98 : f32 to vector<8x32xf32>
    %335 = arith.addf %334, %333 : vector<8x32xf32>
    %336 = arith.divf %334, %335 : vector<8x32xf32>
    %337 = arith.mulf %330, %336 : vector<8x32xf32>
    %cst_99 = arith.constant -2.200000e+00 : f32
    %338 = vector.broadcast %cst_99 : f32 to vector<8x32xf32>
    %339 = arith.cmpf oge, %330, %338 : vector<8x32xf32>
    %340 = arith.extui %339 : vector<8x32xi1> to vector<8x32xi32>
    %341 = arith.sitofp %340 : vector<8x32xi32> to vector<8x32xf32>
    %cst_100 = arith.constant -1.800000e+00 : f32
    %342 = vector.broadcast %cst_100 : f32 to vector<8x32xf32>
    %343 = arith.cmpf oge, %330, %342 : vector<8x32xf32>
    %344 = arith.extui %343 : vector<8x32xi1> to vector<8x32xi32>
    %345 = arith.sitofp %344 : vector<8x32xi32> to vector<8x32xf32>
    %cst_101 = arith.constant -1.400000e+00 : f32
    %346 = vector.broadcast %cst_101 : f32 to vector<8x32xf32>
    %347 = arith.cmpf oge, %330, %346 : vector<8x32xf32>
    %348 = arith.extui %347 : vector<8x32xi1> to vector<8x32xi32>
    %349 = arith.sitofp %348 : vector<8x32xi32> to vector<8x32xf32>
    %cst_102 = arith.constant -1.000000e+00 : f32
    %350 = vector.broadcast %cst_102 : f32 to vector<8x32xf32>
    %351 = arith.cmpf oge, %330, %350 : vector<8x32xf32>
    %352 = arith.extui %351 : vector<8x32xi1> to vector<8x32xi32>
    %353 = arith.sitofp %352 : vector<8x32xi32> to vector<8x32xf32>
    %cst_103 = arith.constant -6.000000e-01 : f32
    %354 = vector.broadcast %cst_103 : f32 to vector<8x32xf32>
    %355 = arith.cmpf oge, %330, %354 : vector<8x32xf32>
    %356 = arith.extui %355 : vector<8x32xi1> to vector<8x32xi32>
    %357 = arith.sitofp %356 : vector<8x32xi32> to vector<8x32xf32>
    %cst_104 = arith.constant -2.000000e-01 : f32
    %358 = vector.broadcast %cst_104 : f32 to vector<8x32xf32>
    %359 = arith.cmpf oge, %330, %358 : vector<8x32xf32>
    %360 = arith.extui %359 : vector<8x32xi1> to vector<8x32xi32>
    %361 = arith.sitofp %360 : vector<8x32xi32> to vector<8x32xf32>
    %cst_105 = arith.constant 2.000000e-01 : f32
    %362 = vector.broadcast %cst_105 : f32 to vector<8x32xf32>
    %363 = arith.cmpf oge, %330, %362 : vector<8x32xf32>
    %364 = arith.extui %363 : vector<8x32xi1> to vector<8x32xi32>
    %365 = arith.sitofp %364 : vector<8x32xi32> to vector<8x32xf32>
    %cst_106 = arith.constant 6.000000e-01 : f32
    %366 = vector.broadcast %cst_106 : f32 to vector<8x32xf32>
    %367 = arith.cmpf oge, %330, %366 : vector<8x32xf32>
    %368 = arith.extui %367 : vector<8x32xi1> to vector<8x32xi32>
    %369 = arith.sitofp %368 : vector<8x32xi32> to vector<8x32xf32>
    %cst_107 = arith.constant 1.000000e+00 : f32
    %370 = vector.broadcast %cst_107 : f32 to vector<8x32xf32>
    %371 = arith.cmpf oge, %330, %370 : vector<8x32xf32>
    %372 = arith.extui %371 : vector<8x32xi1> to vector<8x32xi32>
    %373 = arith.sitofp %372 : vector<8x32xi32> to vector<8x32xf32>
    %cst_108 = arith.constant 1.400000e+00 : f32
    %374 = vector.broadcast %cst_108 : f32 to vector<8x32xf32>
    %375 = arith.cmpf oge, %330, %374 : vector<8x32xf32>
    %376 = arith.extui %375 : vector<8x32xi1> to vector<8x32xi32>
    %377 = arith.sitofp %376 : vector<8x32xi32> to vector<8x32xf32>
    %cst_109 = arith.constant 1.800000e+00 : f32
    %378 = vector.broadcast %cst_109 : f32 to vector<8x32xf32>
    %379 = arith.cmpf oge, %330, %378 : vector<8x32xf32>
    %380 = arith.extui %379 : vector<8x32xi1> to vector<8x32xi32>
    %381 = arith.sitofp %380 : vector<8x32xi32> to vector<8x32xf32>
    %cst_110 = arith.constant 2.200000e+00 : f32
    %382 = vector.broadcast %cst_110 : f32 to vector<8x32xf32>
    %383 = arith.cmpf oge, %330, %382 : vector<8x32xf32>
    %384 = arith.extui %383 : vector<8x32xi1> to vector<8x32xi32>
    %385 = arith.sitofp %384 : vector<8x32xi32> to vector<8x32xf32>
    %386 = arith.subf %341, %345 : vector<8x32xf32>
    %387 = arith.subf %345, %349 : vector<8x32xf32>
    %388 = arith.subf %349, %353 : vector<8x32xf32>
    %389 = arith.subf %353, %357 : vector<8x32xf32>
    %390 = arith.subf %357, %361 : vector<8x32xf32>
    %391 = arith.subf %361, %365 : vector<8x32xf32>
    %392 = arith.subf %365, %369 : vector<8x32xf32>
    %393 = arith.subf %369, %373 : vector<8x32xf32>
    %394 = arith.subf %373, %377 : vector<8x32xf32>
    %395 = arith.subf %377, %381 : vector<8x32xf32>
    %396 = arith.subf %381, %385 : vector<8x32xf32>
    %cst_111 = arith.constant 2.500000e+00 : f32
    %397 = vector.broadcast %cst_111 : f32 to vector<8x32xf32>
    %398 = arith.mulf %330, %397 : vector<8x32xf32>
    %cst_112 = arith.constant -5.500000e+00 : f32
    %399 = vector.broadcast %cst_112 : f32 to vector<8x32xf32>
    %400 = arith.subf %398, %399 : vector<8x32xf32>
    %cst_113 = arith.constant -4.500000e+00 : f32
    %401 = vector.broadcast %cst_113 : f32 to vector<8x32xf32>
    %402 = arith.subf %398, %401 : vector<8x32xf32>
    %cst_114 = arith.constant -3.500000e+00 : f32
    %403 = vector.broadcast %cst_114 : f32 to vector<8x32xf32>
    %404 = arith.subf %398, %403 : vector<8x32xf32>
    %cst_115 = arith.constant -2.500000e+00 : f32
    %405 = vector.broadcast %cst_115 : f32 to vector<8x32xf32>
    %406 = arith.subf %398, %405 : vector<8x32xf32>
    %cst_116 = arith.constant -1.500000e+00 : f32
    %407 = vector.broadcast %cst_116 : f32 to vector<8x32xf32>
    %408 = arith.subf %398, %407 : vector<8x32xf32>
    %cst_117 = arith.constant -5.000000e-01 : f32
    %409 = vector.broadcast %cst_117 : f32 to vector<8x32xf32>
    %410 = arith.subf %398, %409 : vector<8x32xf32>
    %cst_118 = arith.constant 5.000000e-01 : f32
    %411 = vector.broadcast %cst_118 : f32 to vector<8x32xf32>
    %412 = arith.subf %398, %411 : vector<8x32xf32>
    %cst_119 = arith.constant 1.500000e+00 : f32
    %413 = vector.broadcast %cst_119 : f32 to vector<8x32xf32>
    %414 = arith.subf %398, %413 : vector<8x32xf32>
    %cst_120 = arith.constant 2.500000e+00 : f32
    %415 = vector.broadcast %cst_120 : f32 to vector<8x32xf32>
    %416 = arith.subf %398, %415 : vector<8x32xf32>
    %cst_121 = arith.constant 3.500000e+00 : f32
    %417 = vector.broadcast %cst_121 : f32 to vector<8x32xf32>
    %418 = arith.subf %398, %417 : vector<8x32xf32>
    %cst_122 = arith.constant 4.500000e+00 : f32
    %419 = vector.broadcast %cst_122 : f32 to vector<8x32xf32>
    %420 = arith.subf %398, %419 : vector<8x32xf32>
    %421 = arith.mulf %400, %386 : vector<8x32xf32>
    %cst_123 = arith.constant 1.000000e+00 : f32
    %422 = vector.broadcast %cst_123 : f32 to vector<8x32xf32>
    %423 = arith.subf %422, %402 : vector<8x32xf32>
    %424 = arith.mulf %423, %387 : vector<8x32xf32>
    %425 = arith.addf %421, %424 : vector<8x32xf32>
    %426 = arith.mulf %402, %387 : vector<8x32xf32>
    %cst_124 = arith.constant 1.000000e+00 : f32
    %427 = vector.broadcast %cst_124 : f32 to vector<8x32xf32>
    %428 = arith.subf %427, %404 : vector<8x32xf32>
    %429 = arith.mulf %428, %388 : vector<8x32xf32>
    %430 = arith.addf %426, %429 : vector<8x32xf32>
    %431 = arith.mulf %404, %388 : vector<8x32xf32>
    %cst_125 = arith.constant 1.000000e+00 : f32
    %432 = vector.broadcast %cst_125 : f32 to vector<8x32xf32>
    %433 = arith.subf %432, %406 : vector<8x32xf32>
    %434 = arith.mulf %433, %389 : vector<8x32xf32>
    %435 = arith.addf %431, %434 : vector<8x32xf32>
    %436 = arith.mulf %406, %389 : vector<8x32xf32>
    %cst_126 = arith.constant 1.000000e+00 : f32
    %437 = vector.broadcast %cst_126 : f32 to vector<8x32xf32>
    %438 = arith.subf %437, %408 : vector<8x32xf32>
    %439 = arith.mulf %438, %390 : vector<8x32xf32>
    %440 = arith.addf %436, %439 : vector<8x32xf32>
    %441 = arith.mulf %408, %390 : vector<8x32xf32>
    %cst_127 = arith.constant 1.000000e+00 : f32
    %442 = vector.broadcast %cst_127 : f32 to vector<8x32xf32>
    %443 = arith.subf %442, %410 : vector<8x32xf32>
    %444 = arith.mulf %443, %391 : vector<8x32xf32>
    %445 = arith.addf %441, %444 : vector<8x32xf32>
    %446 = arith.mulf %410, %391 : vector<8x32xf32>
    %cst_128 = arith.constant 1.000000e+00 : f32
    %447 = vector.broadcast %cst_128 : f32 to vector<8x32xf32>
    %448 = arith.subf %447, %412 : vector<8x32xf32>
    %449 = arith.mulf %448, %392 : vector<8x32xf32>
    %450 = arith.addf %446, %449 : vector<8x32xf32>
    %451 = arith.mulf %412, %392 : vector<8x32xf32>
    %cst_129 = arith.constant 1.000000e+00 : f32
    %452 = vector.broadcast %cst_129 : f32 to vector<8x32xf32>
    %453 = arith.subf %452, %414 : vector<8x32xf32>
    %454 = arith.mulf %453, %393 : vector<8x32xf32>
    %455 = arith.addf %451, %454 : vector<8x32xf32>
    %456 = arith.mulf %414, %393 : vector<8x32xf32>
    %cst_130 = arith.constant 1.000000e+00 : f32
    %457 = vector.broadcast %cst_130 : f32 to vector<8x32xf32>
    %458 = arith.subf %457, %416 : vector<8x32xf32>
    %459 = arith.mulf %458, %394 : vector<8x32xf32>
    %460 = arith.addf %456, %459 : vector<8x32xf32>
    %461 = arith.mulf %416, %394 : vector<8x32xf32>
    %cst_131 = arith.constant 1.000000e+00 : f32
    %462 = vector.broadcast %cst_131 : f32 to vector<8x32xf32>
    %463 = arith.subf %462, %418 : vector<8x32xf32>
    %464 = arith.mulf %463, %395 : vector<8x32xf32>
    %465 = arith.addf %461, %464 : vector<8x32xf32>
    %466 = arith.mulf %418, %395 : vector<8x32xf32>
    %cst_132 = arith.constant 1.000000e+00 : f32
    %467 = vector.broadcast %cst_132 : f32 to vector<8x32xf32>
    %468 = arith.subf %467, %420 : vector<8x32xf32>
    %469 = arith.mulf %468, %396 : vector<8x32xf32>
    %470 = arith.addf %466, %469 : vector<8x32xf32>
    %cst_133 = arith.constant 1.250000e+00 : f32
    %471 = vector.broadcast %cst_133 : f32 to vector<8x32xf32>
    %472 = arith.mulf %330, %471 : vector<8x32xf32>
    %cst_134 = arith.constant -2.750000e+00 : f32
    %473 = vector.broadcast %cst_134 : f32 to vector<8x32xf32>
    %474 = arith.subf %472, %473 : vector<8x32xf32>
    %cst_135 = arith.constant -2.250000e+00 : f32
    %475 = vector.broadcast %cst_135 : f32 to vector<8x32xf32>
    %476 = arith.subf %472, %475 : vector<8x32xf32>
    %cst_136 = arith.constant -1.750000e+00 : f32
    %477 = vector.broadcast %cst_136 : f32 to vector<8x32xf32>
    %478 = arith.subf %472, %477 : vector<8x32xf32>
    %cst_137 = arith.constant -1.250000e+00 : f32
    %479 = vector.broadcast %cst_137 : f32 to vector<8x32xf32>
    %480 = arith.subf %472, %479 : vector<8x32xf32>
    %cst_138 = arith.constant -7.500000e-01 : f32
    %481 = vector.broadcast %cst_138 : f32 to vector<8x32xf32>
    %482 = arith.subf %472, %481 : vector<8x32xf32>
    %cst_139 = arith.constant -2.500000e-01 : f32
    %483 = vector.broadcast %cst_139 : f32 to vector<8x32xf32>
    %484 = arith.subf %472, %483 : vector<8x32xf32>
    %cst_140 = arith.constant 2.500000e-01 : f32
    %485 = vector.broadcast %cst_140 : f32 to vector<8x32xf32>
    %486 = arith.subf %472, %485 : vector<8x32xf32>
    %cst_141 = arith.constant 7.500000e-01 : f32
    %487 = vector.broadcast %cst_141 : f32 to vector<8x32xf32>
    %488 = arith.subf %472, %487 : vector<8x32xf32>
    %cst_142 = arith.constant 1.250000e+00 : f32
    %489 = vector.broadcast %cst_142 : f32 to vector<8x32xf32>
    %490 = arith.subf %472, %489 : vector<8x32xf32>
    %cst_143 = arith.constant 1.750000e+00 : f32
    %491 = vector.broadcast %cst_143 : f32 to vector<8x32xf32>
    %492 = arith.subf %472, %491 : vector<8x32xf32>
    %493 = arith.mulf %474, %425 : vector<8x32xf32>
    %cst_144 = arith.constant 1.000000e+00 : f32
    %494 = vector.broadcast %cst_144 : f32 to vector<8x32xf32>
    %495 = arith.subf %494, %476 : vector<8x32xf32>
    %496 = arith.mulf %495, %430 : vector<8x32xf32>
    %497 = arith.addf %493, %496 : vector<8x32xf32>
    %498 = arith.mulf %476, %430 : vector<8x32xf32>
    %cst_145 = arith.constant 1.000000e+00 : f32
    %499 = vector.broadcast %cst_145 : f32 to vector<8x32xf32>
    %500 = arith.subf %499, %478 : vector<8x32xf32>
    %501 = arith.mulf %500, %435 : vector<8x32xf32>
    %502 = arith.addf %498, %501 : vector<8x32xf32>
    %503 = arith.mulf %478, %435 : vector<8x32xf32>
    %cst_146 = arith.constant 1.000000e+00 : f32
    %504 = vector.broadcast %cst_146 : f32 to vector<8x32xf32>
    %505 = arith.subf %504, %480 : vector<8x32xf32>
    %506 = arith.mulf %505, %440 : vector<8x32xf32>
    %507 = arith.addf %503, %506 : vector<8x32xf32>
    %508 = arith.mulf %480, %440 : vector<8x32xf32>
    %cst_147 = arith.constant 1.000000e+00 : f32
    %509 = vector.broadcast %cst_147 : f32 to vector<8x32xf32>
    %510 = arith.subf %509, %482 : vector<8x32xf32>
    %511 = arith.mulf %510, %445 : vector<8x32xf32>
    %512 = arith.addf %508, %511 : vector<8x32xf32>
    %513 = arith.mulf %482, %445 : vector<8x32xf32>
    %cst_148 = arith.constant 1.000000e+00 : f32
    %514 = vector.broadcast %cst_148 : f32 to vector<8x32xf32>
    %515 = arith.subf %514, %484 : vector<8x32xf32>
    %516 = arith.mulf %515, %450 : vector<8x32xf32>
    %517 = arith.addf %513, %516 : vector<8x32xf32>
    %518 = arith.mulf %484, %450 : vector<8x32xf32>
    %cst_149 = arith.constant 1.000000e+00 : f32
    %519 = vector.broadcast %cst_149 : f32 to vector<8x32xf32>
    %520 = arith.subf %519, %486 : vector<8x32xf32>
    %521 = arith.mulf %520, %455 : vector<8x32xf32>
    %522 = arith.addf %518, %521 : vector<8x32xf32>
    %523 = arith.mulf %486, %455 : vector<8x32xf32>
    %cst_150 = arith.constant 1.000000e+00 : f32
    %524 = vector.broadcast %cst_150 : f32 to vector<8x32xf32>
    %525 = arith.subf %524, %488 : vector<8x32xf32>
    %526 = arith.mulf %525, %460 : vector<8x32xf32>
    %527 = arith.addf %523, %526 : vector<8x32xf32>
    %528 = arith.mulf %488, %460 : vector<8x32xf32>
    %cst_151 = arith.constant 1.000000e+00 : f32
    %529 = vector.broadcast %cst_151 : f32 to vector<8x32xf32>
    %530 = arith.subf %529, %490 : vector<8x32xf32>
    %531 = arith.mulf %530, %465 : vector<8x32xf32>
    %532 = arith.addf %528, %531 : vector<8x32xf32>
    %533 = arith.mulf %490, %465 : vector<8x32xf32>
    %cst_152 = arith.constant 1.000000e+00 : f32
    %534 = vector.broadcast %cst_152 : f32 to vector<8x32xf32>
    %535 = arith.subf %534, %492 : vector<8x32xf32>
    %536 = arith.mulf %535, %470 : vector<8x32xf32>
    %537 = arith.addf %533, %536 : vector<8x32xf32>
    %cst_153 = arith.constant 0.833333313 : f32
    %538 = vector.broadcast %cst_153 : f32 to vector<8x32xf32>
    %539 = arith.mulf %330, %538 : vector<8x32xf32>
    %cst_154 = arith.constant -1.83333337 : f32
    %540 = vector.broadcast %cst_154 : f32 to vector<8x32xf32>
    %541 = arith.subf %539, %540 : vector<8x32xf32>
    %cst_155 = arith.constant -1.500000e+00 : f32
    %542 = vector.broadcast %cst_155 : f32 to vector<8x32xf32>
    %543 = arith.subf %539, %542 : vector<8x32xf32>
    %cst_156 = arith.constant -1.16666663 : f32
    %544 = vector.broadcast %cst_156 : f32 to vector<8x32xf32>
    %545 = arith.subf %539, %544 : vector<8x32xf32>
    %cst_157 = arith.constant -0.833333313 : f32
    %546 = vector.broadcast %cst_157 : f32 to vector<8x32xf32>
    %547 = arith.subf %539, %546 : vector<8x32xf32>
    %cst_158 = arith.constant -5.000000e-01 : f32
    %548 = vector.broadcast %cst_158 : f32 to vector<8x32xf32>
    %549 = arith.subf %539, %548 : vector<8x32xf32>
    %cst_159 = arith.constant -0.166666672 : f32
    %550 = vector.broadcast %cst_159 : f32 to vector<8x32xf32>
    %551 = arith.subf %539, %550 : vector<8x32xf32>
    %cst_160 = arith.constant 0.166666672 : f32
    %552 = vector.broadcast %cst_160 : f32 to vector<8x32xf32>
    %553 = arith.subf %539, %552 : vector<8x32xf32>
    %cst_161 = arith.constant 5.000000e-01 : f32
    %554 = vector.broadcast %cst_161 : f32 to vector<8x32xf32>
    %555 = arith.subf %539, %554 : vector<8x32xf32>
    %cst_162 = arith.constant 0.833333313 : f32
    %556 = vector.broadcast %cst_162 : f32 to vector<8x32xf32>
    %557 = arith.subf %539, %556 : vector<8x32xf32>
    %558 = arith.mulf %541, %497 : vector<8x32xf32>
    %cst_163 = arith.constant 1.000000e+00 : f32
    %559 = vector.broadcast %cst_163 : f32 to vector<8x32xf32>
    %560 = arith.subf %559, %543 : vector<8x32xf32>
    %561 = arith.mulf %560, %502 : vector<8x32xf32>
    %562 = arith.addf %558, %561 : vector<8x32xf32>
    %563 = arith.mulf %543, %502 : vector<8x32xf32>
    %cst_164 = arith.constant 1.000000e+00 : f32
    %564 = vector.broadcast %cst_164 : f32 to vector<8x32xf32>
    %565 = arith.subf %564, %545 : vector<8x32xf32>
    %566 = arith.mulf %565, %507 : vector<8x32xf32>
    %567 = arith.addf %563, %566 : vector<8x32xf32>
    %568 = arith.mulf %545, %507 : vector<8x32xf32>
    %cst_165 = arith.constant 1.000000e+00 : f32
    %569 = vector.broadcast %cst_165 : f32 to vector<8x32xf32>
    %570 = arith.subf %569, %547 : vector<8x32xf32>
    %571 = arith.mulf %570, %512 : vector<8x32xf32>
    %572 = arith.addf %568, %571 : vector<8x32xf32>
    %573 = arith.mulf %547, %512 : vector<8x32xf32>
    %cst_166 = arith.constant 1.000000e+00 : f32
    %574 = vector.broadcast %cst_166 : f32 to vector<8x32xf32>
    %575 = arith.subf %574, %549 : vector<8x32xf32>
    %576 = arith.mulf %575, %517 : vector<8x32xf32>
    %577 = arith.addf %573, %576 : vector<8x32xf32>
    %578 = arith.mulf %549, %517 : vector<8x32xf32>
    %cst_167 = arith.constant 1.000000e+00 : f32
    %579 = vector.broadcast %cst_167 : f32 to vector<8x32xf32>
    %580 = arith.subf %579, %551 : vector<8x32xf32>
    %581 = arith.mulf %580, %522 : vector<8x32xf32>
    %582 = arith.addf %578, %581 : vector<8x32xf32>
    %583 = arith.mulf %551, %522 : vector<8x32xf32>
    %cst_168 = arith.constant 1.000000e+00 : f32
    %584 = vector.broadcast %cst_168 : f32 to vector<8x32xf32>
    %585 = arith.subf %584, %553 : vector<8x32xf32>
    %586 = arith.mulf %585, %527 : vector<8x32xf32>
    %587 = arith.addf %583, %586 : vector<8x32xf32>
    %588 = arith.mulf %553, %527 : vector<8x32xf32>
    %cst_169 = arith.constant 1.000000e+00 : f32
    %589 = vector.broadcast %cst_169 : f32 to vector<8x32xf32>
    %590 = arith.subf %589, %555 : vector<8x32xf32>
    %591 = arith.mulf %590, %532 : vector<8x32xf32>
    %592 = arith.addf %588, %591 : vector<8x32xf32>
    %593 = arith.mulf %555, %532 : vector<8x32xf32>
    %cst_170 = arith.constant 1.000000e+00 : f32
    %594 = vector.broadcast %cst_170 : f32 to vector<8x32xf32>
    %595 = arith.subf %594, %557 : vector<8x32xf32>
    %596 = arith.mulf %595, %537 : vector<8x32xf32>
    %597 = arith.addf %593, %596 : vector<8x32xf32>
    %598 = arith.truncf %337 : vector<8x32xf32> to vector<8x32xbf16>
    %599 = arith.truncf %562 : vector<8x32xf32> to vector<8x32xbf16>
    %600 = arith.truncf %567 : vector<8x32xf32> to vector<8x32xbf16>
    %601 = arith.truncf %572 : vector<8x32xf32> to vector<8x32xbf16>
    %602 = arith.truncf %577 : vector<8x32xf32> to vector<8x32xbf16>
    %603 = arith.truncf %582 : vector<8x32xf32> to vector<8x32xbf16>
    %604 = arith.truncf %587 : vector<8x32xf32> to vector<8x32xbf16>
    %605 = arith.truncf %592 : vector<8x32xf32> to vector<8x32xbf16>
    %606 = arith.truncf %597 : vector<8x32xf32> to vector<8x32xbf16>
    %607 = tpu.concatenate %598, %599, %600, %601, %602, %603, %604, %605, %606 in 1 : vector<8x32xbf16>, vector<8x32xbf16>, vector<8x32xbf16>, vector<8x32xbf16>, vector<8x32xbf16>, vector<8x32xbf16>, vector<8x32xbf16>, vector<8x32xbf16>, vector<8x32xbf16> -> vector<8x288xbf16>
    %cst_171 = arith.constant dense<0.000000e+00> : vector<8x8xf32>
    %608 = tpu.matmul %607, %331, %cst_171 {dimension_numbers = #tpu.dot_dimension_numbers<[1], [0], [0], [1], [0, 0, 1, 1], [], []>} : vector<8x288xbf16>, vector<288x8xbf16>, vector<8x8xf32> -> vector<8x8xf32>
    %c0_172 = arith.constant 0 : index
    %c0_173 = arith.constant 0 : index
    %609 = vector.load %arg5[%c0_172, %c0_173] : memref<8x8xf32, #tpu.memory_space<vmem>>, vector<8x8xf32>
    tpu.vector_store %arg5[%c0_172, %c0_173], %608 {strides = array<i32>} : memref<8x8xf32, #tpu.memory_space<vmem>>, vector<8x8xf32>,
    return
  }
  func.func @transform_0(%arg0: i32) -> (i32, i32) {
    %c0_i32 = arith.constant 0 : i32
    %c0_i32_0 = arith.constant 0 : i32
    return %arg0, %c0_i32 : i32, i32
  }
  func.func @transform_1(%arg0: i32) -> (i32, i32) {
    %c0_i32 = arith.constant 0 : i32
    %c0_i32_0 = arith.constant 0 : i32
    %c0_i32_1 = arith.constant 0 : i32
    return %c0_i32, %c0_i32_0 : i32, i32
  }
  func.func @transform_2(%arg0: i32) -> (i32, i32) {
    %c0_i32 = arith.constant 0 : i32
    %c0_i32_0 = arith.constant 0 : i32
    %c0_i32_1 = arith.constant 0 : i32
    return %c0_i32, %c0_i32_0 : i32, i32
  }
  func.func @transform_3(%arg0: i32) -> (i32, i32) {
    %c0_i32 = arith.constant 0 : i32
    %c0_i32_0 = arith.constant 0 : i32
    %c0_i32_1 = arith.constant 0 : i32
    return %c0_i32, %c0_i32_0 : i32, i32
  }
  func.func @transform_4(%arg0: i32) -> (i32, i32) {
    %c0_i32 = arith.constant 0 : i32
    %c0_i32_0 = arith.constant 0 : i32
    return %arg0, %c0_i32 : i32, i32
  }
}

</mosaic_0001>

<bundles_post_ra>
// kernel: tpu_custom_call.1
= control target key start
LH: loop header
LB: loop body
LE: loop exit
PB: predicated region body
PF: predicated region fallthrough
CT: control target
= control target key end

     0   :  { %s1369_s15 = smov 0   ;;  %s1684_s0 = inlined_call_operand.vmem [shape: f32[16,8], index: 0, kind: input, shape index: {}]   ;;  %s1685_s1 = inlined_call_operand.vmem [shape: f32[1,8], index: 1, kind: input, shape index: {}]   ;;  %s1686_s2 = inlined_call_operand.vmem [shape: bf16[72,32], index: 2, kind: input, shape index: {}]   ;;  %s1687_s3 = inlined_call_operand.vmem [shape: bf16[288,8], index: 3, kind: input, shape index: {}]   ;;  %s1688_s4 = inlined_call_operand.vmem [shape: f32[16,8], index: 4, kind: output, shape index: {}]  }
   0x1 LB: > { %s1093_s16 = sadd.s32 4294967295, %s1330_s15   ;;  %p1097_p0 = scmp.ge.s32.totalorder %s1330_s15, 1  ;;  %s1330_s15 = sphi %s1369_s15, %s14_s15  }
   0x2   : > { %p161_p1 = scmp.lt.s32.totalorder %s1330_s15, 3 }
   0x4   : > { %p162_p2 = pnand %p1097_p0, %p161_p1 }
   0x5   : > { %p185_p3 = scmp.lt.s32.totalorder (!%p162_p2), %s1093_s16, 1  ;;  %vm197_vm0 = vcmask (!%p162_p2), 64512   ;;  %v1332_v3 = vmov (!%p162_p2), 0.0   ;;  %v1100_v7 = vld [vmem:[%s1685_s1] ss:$0 sm:$0xff] (!%p162_p2)  ;;  %s1333_s25 = smov (!%p162_p2), 16  }
   0x6   : > { %165 = sbr.rel (%p162_p2) target bundleno = 999 (0x3e7), region = 36  ;;  %1245 = vmatprep.subr.bf16.mxu0 (!%p162_p2), %v1332_v3  ;;  %s1334_s30 = smov (!%p162_p2), 8   ;;  %vm502_vm13 = vcmask (!%p162_p2), 1043456   ;;  %vm1339_vm14 = vmmov (!%p162_p2), 0   ;;  %vm451_vm15 = vcmask (!%p162_p2), 130048  }
   0x7   : > { %s1335_s5 = smov (!%p162_p2), 24   ;;  %s1336_s8 = smov (!%p162_p2), 32   ;;  %1255 = vmatprep.mubr.msk.bf16.mxu0 (!%p162_p2), %vm1339_vm14, %v1332_v3 }
   0x8   : > { %s1337_s9 = smov (!%p162_p2), 40   ;;  %s1338_s12 = smov (!%p162_p2), 48  }
   0x9   : > { %s1340_s13 = smov (!%p162_p2), 56   ;;  %s1341_s14 = smov (!%p162_p2), 64  }
   0xa   : > { %s1343_s7 = smov (!%p162_p2), 96  }
   0xd   : > { %s1690_s16 = smov (!%p185_p3, %s1093_s16), 1 }
   0xe   : > { %s1098_s17 = sshll.u32 %s1690_s16, 3 }
   0xf   : > { %s188_s20 = scalar_lea.vmem %s1684_s0, %s1098_s17 }
  0x10   : > { %v194_v0 = vld [vmem:[%s188_s20] sm:$0xff] }
  0x11   : > { %v196_v1 = vmul.f32 %v194_v0, %v194_v0 }
  0x13   : > { %v198_v2 = vsel %vm197_vm0, %v196_v1, 0.0 }
  0x14   : > { %199 = vadd.xlane.f32.xlu0 %v198_v2 }
  0xa1   : > { %v200_v4 = vpop.xlane.xlu0 %199 }
  0xa2   : > { %v201_v5 = vmax.f32 %v200_v4, 1e-24 }
  0xa4   : > { %1310 = vrsqrt.f32 %v201_v5 }
  0xae   : > { %v1311_v6 = vpop.eup %1310 }
  0xaf   : > { %v203_v8 = vmul.f32 %v1311_v6, %v194_v0 }
  0xb1   : > { %v1390_v9 = vmul.f32 %v1100_v7, %v203_v8 }
  0xb3   : > { %vm230_vm1 = vcmp.ge.f32.partialorder %v1390_v9, -1.8  ;;  %vm233_vm2 = vcmp.ge.f32.partialorder %v1390_v9, -1.4  ;;  %vm236_vm3 = vcmp.ge.f32.partialorder %v1390_v9, -1.0  ;;  %v1396_v10 = vmul.f32 2.5, %v1390_v9 }
  0xb4   : > { %v1103_v11 = vsel %vm230_vm1, 1.0, %v1332_v3  ;;  %v1104_v12 = vsel %vm233_vm2, 1.0, %v1332_v3  ;;  %v1105_v13 = vsel %vm236_vm3, 1.0, %v1332_v3  ;;  %vm239_vm4 = vcmp.ge.f32.partialorder %v1390_v9, -0.6 }
  0xb5   : > { %v1106_v14 = vsel %vm239_vm4, 1.0, %v1332_v3  ;;  %vm242_vm5 = vcmp.ge.f32.partialorder %v1390_v9, -0.2  ;;  %vm245_vm6 = vcmp.ge.f32.partialorder %v1390_v9, 0.2  ;;  %v264_v15 = vsub.f32 %v1103_v11, %v1104_v12 }
  0xb6   : > { %v1107_v16 = vsel %vm242_vm5, 1.0, %v1332_v3  ;;  %v1407_v17 = vsel %vm245_vm6, 1.0, %v1332_v3  ;;  %v265_v18 = vsub.f32 %v1104_v12, %v1105_v13  ;;  %v266_v19 = vsub.f32 %v1105_v13, %v1106_v14 }
  0xb7   : > { %v267_v20 = vsub.f32 %v1106_v14, %v1107_v16  ;;  %v1115_v21 = vadd.f32 4.5, %v1396_v10  ;;  %v1116_v22 = vadd.f32 3.5, %v1396_v10  ;;  %v1117_v23 = vadd.f32 2.5, %v1396_v10 }
  0xb8   : > { %v1118_v24 = vadd.f32 1.5, %v1396_v10  ;;  %v1414_v25 = vmul.f32 1.25, %v1390_v9  ;;  %v1417_v26 = vmul.f32 0.8333333, %v1390_v9  ;;  %v1420_v27 = vsub.f32 %v1107_v16, %v1407_v17 }
  0xb9   : > { %v287_v28 = vsub.f32 1.0, %v1115_v21  ;;  %v290_v29 = vmul.f32 %v1115_v21, %v264_v15  ;;  %v291_v30 = vsub.f32 1.0, %v1116_v22  ;;  %v294_v31 = vmul.f32 %v1116_v22, %v265_v18  ;;  %v1287_v21 = vld [vmem:[%s1686_s2] sm:$0xff]  }
  0xba   : > { %v295_v32 = vsub.f32 1.0, %v1117_v23  ;;  %v299_v33 = vsub.f32 1.0, %v1118_v24  ;;  %v1126_v34 = vadd.f32 2.25, %v1414_v25  ;;  %v1127_v36 = vadd.f32 1.75, %v1414_v25  ;;  %1246 = vmatpush3.bf16.msra.mxu0 %v1287_v21 }
  0xbb   : > { %v292_v35 = vmul.f32 %v291_v30, %v265_v18  ;;  %v1128_v37 = vadd.f32 1.25, %v1414_v25  ;;  %v1136_v38 = vadd.f32 1.5, %v1417_v26  ;;  %v298_v40 = vmul.f32 %v1117_v23, %v266_v19  ;;  %1247 = vmatprep.subr.bf16.mxu0 %v1332_v3 }
  0xbc   : > { %v296_v39 = vmul.f32 %v295_v32, %v266_v19  ;;  %v300_v41 = vmul.f32 %v299_v33, %v267_v20  ;;  %v338_v42 = vsub.f32 1.0, %v1126_v34  ;;  %v342_v44 = vsub.f32 1.0, %v1127_v36 }
  0xbd   : > { %v293_v43 = vadd.f32 %v292_v35, %v290_v29  ;;  %v346_v45 = vsub.f32 1.0, %v1128_v37  ;;  %v1137_v46 = vadd.f32 1.1666666, %v1417_v26  ;;  %v384_v49 = vsub.f32 1.0, %v1136_v38 }
  0xbe   : > { %v297_v47 = vadd.f32 %v296_v39, %v294_v31  ;;  %v301_v48 = vadd.f32 %v300_v41, %v298_v40  ;;  %vm227_vm7 = vcmp.ge.f32.partialorder %v1390_v9, -2.2  ;;  %v1114_v52 = vadd.f32 5.5, %v1396_v10 }
  0xbf   : > { %v341_v50 = vmul.f32 %v1126_v34, %v293_v43  ;;  %v1102_v51 = vsel %vm227_vm7, 1.0, %v1332_v3  ;;  %v288_v53 = vmul.f32 %v287_v28, %v264_v15  ;;  %v388_v58 = vsub.f32 1.0, %v1137_v46 }
  0xc0   : > { %v343_v54 = vmul.f32 %v342_v44, %v297_v47  ;;  %v345_v55 = vmul.f32 %v1127_v36, %v297_v47  ;;  %v347_v56 = vmul.f32 %v346_v45, %v301_v48  ;;  %v263_v57 = vsub.f32 %v1102_v51, %v1103_v11 }
  0xc1   : > { %v1125_v59 = vadd.f32 2.75, %v1414_v25  ;;  %v339_v60 = vmul.f32 %v338_v42, %v293_v43  ;;  %v1119_v61 = vadd.f32 0.5, %v1396_v10  ;;  %v1135_v1 = vadd.f32 1.8333334, %v1417_v26 }
  0xc2   : > { %v344_v62 = vadd.f32 %v343_v54, %v341_v50  ;;  %v348_v63 = vadd.f32 %v347_v56, %v345_v55  ;;  %v286_v0 = vmul.f32 %v1114_v52, %v263_v57  ;;  %v302_v2 = vmul.f32 %v1118_v24, %v267_v20 }
  0xc3   : > { %v303_v4 = vsub.f32 1.0, %v1119_v61  ;;  %v1129_v5 = vadd.f32 0.75, %v1414_v25  ;;  %v1138_v6 = vadd.f32 0.8333333, %v1417_v26  ;;  %v349_v12 = vmul.f32 %v1128_v37, %v301_v48 }
  0xc4   : > { %v387_v7 = vmul.f32 %v1136_v38, %v344_v62  ;;  %v389_v8 = vmul.f32 %v388_v58, %v348_v63  ;;  %v289_v11 = vadd.f32 %v288_v53, %v286_v0  ;;  %v385_v13 = vmul.f32 %v384_v49, %v344_v62  ;;  %v1289_v58 = vld [vmem:[%s1686_s2 + $0x10] sm:$0xff]  }
  0xc5   : > { %v304_v14 = vmul.f32 %v303_v4, %v1420_v27  ;;  %v350_v15 = vsub.f32 1.0, %v1129_v5  ;;  %v391_v16 = vmul.f32 %v1137_v46, %v348_v63  ;;  %vm248_vm8 = vcmp.ge.f32.partialorder %v1390_v9, 0.6 }
  0xc6   : > { %v390_v18 = vadd.f32 %v389_v8, %v387_v7  ;;  %v337_v19 = vmul.f32 %v1125_v59, %v289_v11  ;;  %v1120_v20 = vadd.f32 -0.5, %v1396_v10  ;;  %v392_v23 = vsub.f32 1.0, %v1138_v6 }
  0xc7   : > { %v305_v22 = vadd.f32 %v304_v14, %v302_v2  ;;  %v1109_v24 = vsel %vm248_vm8, 1.0, %v1332_v3  ;;  %v1130_v28 = vadd.f32 0.25, %v1414_v25  ;;  %v306_v34 = vmul.f32 %v1119_v61, %v1420_v27  ;;  %v1288_v27 = vld [vmem:[%s1686_s2 + $0x8] sm:$0xff]  }
  0xc8   : > { %v417_v29 = vpack.c.bf16 %v390_v18, %v390_v18  ;;  %v340_v30 = vadd.f32 %v339_v60, %v337_v19  ;;  %v269_v31 = vsub.f32 %v1407_v17, %v1109_v24  ;;  %v307_v32 = vsub.f32 1.0, %v1120_v20  ;;  %1248 = vmatpush3.bf16.msra.mxu0 %v1288_v27  ;;  %v1290_v19 = vld [vmem:[%s1686_s2 + $0x18] sm:$0xff]  }
  0xc9   : > { %v351_v33 = vmul.f32 %v350_v15, %v305_v22  ;;  %v353_v35 = vmul.f32 %v1129_v5, %v305_v22  ;;  %v1139_v36 = vadd.f32 0.5, %v1417_v26  ;;  %vm251_vm9 = vcmp.ge.f32.partialorder %v1390_v9, 1.0  ;;  %1249 = vmatprep.subr.bf16.mxu0 %v1332_v3 }
  0xca   : > { %428 = vrot.lane.b32.xlu1 %v417_v29, %s1333_s25  ;;  %v383_v37 = vmul.f32 %v1135_v1, %v340_v30  ;;  %v308_v38 = vmul.f32 %v307_v32, %v269_v31  ;;  %v1121_v39 = vadd.f32 -1.5, %v1396_v10  ;;  %v354_v17 = vsub.f32 1.0, %v1130_v28 }
  0xcb   : > { %v352_v40 = vadd.f32 %v351_v33, %v349_v12  ;;  %v396_v41 = vsub.f32 1.0, %v1139_v36  ;;  %v1110_v42 = vsel %vm251_vm9, 1.0, %v1332_v3  ;;  %v310_v48 = vmul.f32 %v1120_v20, %v269_v31 }
  0xcc   : > { %v386_v43 = vadd.f32 %v385_v13, %v383_v37  ;;  %v309_v44 = vadd.f32 %v308_v38, %v306_v34  ;;  %v270_v45 = vsub.f32 %v1109_v24, %v1110_v42  ;;  %v311_v46 = vsub.f32 1.0, %v1121_v39  ;;  %1250 = vmatpush3.bf16.msra.mxu0 %v1289_v58 }
  0xcd   : > { %v393_v47 = vmul.f32 %v392_v23, %v352_v40  ;;  %v1131_v49 = vadd.f32 -0.25, %v1414_v25  ;;  %v1140_v50 = vadd.f32 0.16666667, %v1417_v26  ;;  %v395_v53 = vmul.f32 %v1138_v6, %v352_v40  ;;  %1251 = vmatprep.subr.bf16.mxu0 %v1332_v3 }
  0xce   : > { %v416_v51 = vpack.c.bf16 %v386_v43, %v386_v43  ;;  %v355_v52 = vmul.f32 %v354_v17, %v309_v44  ;;  %v312_v54 = vmul.f32 %v311_v46, %v270_v45  ;;  %v357_v56 = vmul.f32 %v1130_v28, %v309_v44 }
  0xcf   : > { %v394_v55 = vadd.f32 %v393_v47, %v391_v16  ;;  %v358_v57 = vsub.f32 1.0, %v1131_v49  ;;  %vm254_vm10 = vcmp.ge.f32.partialorder %v1390_v9, 1.4  ;;  %v1122_v62 = vadd.f32 -2.5, %v1396_v10  ;;  %v1291_v47 = vld [vmem:[%s1686_s2 + $0x20] ss:$0 sps:$4 sm:$0xff]  }
  0xd0   : > { %425 = vrot.lane.b32.xlu0 %v416_v51, %s1334_s30  ;;  %v356_v59 = vadd.f32 %v355_v52, %v353_v35  ;;  %v313_v60 = vadd.f32 %v312_v54, %v310_v48  ;;  %v1111_v61 = vsel %vm254_vm10, 1.0, %v1332_v3  ;;  %v400_v0 = vsub.f32 1.0, %v1140_v50  ;;  %1252 = vmatpush3.bf16.msra.mxu0 %v1290_v19 }
  0xd1   : > { %v418_v63 = vpack.c.bf16 %v394_v55, %v394_v55  ;;  %v271_v1 = vsub.f32 %v1110_v42, %v1111_v61  ;;  %v315_v5 = vsub.f32 1.0, %v1122_v62  ;;  %v1132_v6 = vadd.f32 -0.75, %v1414_v25  ;;  %1253 = vmatprep.subr.bf16.mxu0 %v1332_v3 }
  0xd2   : > { %v397_v2 = vmul.f32 %v396_v41, %v356_v59  ;;  %v359_v4 = vmul.f32 %v358_v57, %v313_v60  ;;  %v399_v7 = vmul.f32 %v1139_v36, %v356_v59  ;;  %v314_v8 = vmul.f32 %v1121_v39, %v270_v45 }
  0xd3   : > { %431 = vrot.lane.b32.xlu1 %v418_v63, %s1335_s5  ;;  %v1141_v11 = vadd.f32 -0.16666667, %v1417_v26  ;;  %vm257_vm11 = vcmp.ge.f32.partialorder %v1390_v9, 1.8  ;;  %v316_v14 = vmul.f32 %v315_v5, %v271_v1  ;;  %v361_v16 = vmul.f32 %v1131_v49, %v313_v60 }
  0xd4   : > { %v398_v12 = vadd.f32 %v397_v2, %v395_v53  ;;  %v360_v13 = vadd.f32 %v359_v4, %v357_v56  ;;  %v1112_v15 = vsel %vm257_vm11, 1.0, %v1332_v3  ;;  %v1123_v18 = vadd.f32 -3.5, %v1396_v10 }
  0xd5   : > { %v317_v22 = vadd.f32 %v316_v14, %v314_v8  ;;  %v362_v23 = vsub.f32 1.0, %v1132_v6  ;;  %v272_v24 = vsub.f32 %v1111_v61, %v1112_v15  ;;  %v1133_v29 = vadd.f32 -1.25, %v1414_v25 }
  0xd6   : > { %v419_v20 = vpack.c.bf16 %v398_v12, %v398_v12  ;;  %v401_v21 = vmul.f32 %v400_v0, %v360_v13  ;;  %v319_v28 = vsub.f32 1.0, %v1123_v18  ;;  %vm260_vm12 = vcmp.ge.f32.partialorder %v1390_v9, 2.2 }
  0xd7   : > { %v363_v31 = vmul.f32 %v362_v23, %v317_v22  ;;  %v404_v32 = vsub.f32 1.0, %v1141_v11  ;;  %v403_v33 = vmul.f32 %v1140_v50, %v360_v13  ;;  %v318_v34 = vmul.f32 %v1122_v62, %v271_v1 }
  0xd8   : > { %434 = vrot.lane.b32.xlu1 %v419_v20, %s1336_s8  ;;  %v402_v30 = vadd.f32 %v401_v21, %v399_v7  ;;  %v320_v35 = vmul.f32 %v319_v28, %v272_v24  ;;  %v1113_v36 = vsel %vm260_vm12, 1.0, %v1332_v3  ;;  %v1142_v39 = vadd.f32 -0.5, %v1417_v26 }
  0xd9   : > { %v364_v38 = vadd.f32 %v363_v31, %v361_v16  ;;  %v1124_v40 = vadd.f32 -4.5, %v1396_v10  ;;  %v365_v41 = vmul.f32 %v1132_v6, %v317_v22  ;;  %v366_v42 = vsub.f32 1.0, %v1133_v29  ;;  %v1292_v31 = vld [vmem:[%s1687_s3 + $0x80] sm:$0xff]  }
  0xda   : > { %v420_v37 = vpack.c.bf16 %v402_v30, %v402_v30  ;;  %v321_v17 = vadd.f32 %v320_v35, %v318_v34  ;;  %v273_v43 = vsub.f32 %v1112_v15, %v1113_v36  ;;  %v1134_v45 = vadd.f32 -1.75, %v1414_v25  ;;  %v1295_v34 = vld [vmem:[%s1687_s3] sm:$0xff]   ;;  %v1296_v35 = vld [vmem:[%s1687_s3 + $0x48] sm:$0xff]  }
  0xdb   : > { %v405_v27 = vmul.f32 %v404_v32, %v364_v38  ;;  %v323_v44 = vsub.f32 1.0, %v1124_v40  ;;  %v408_v49 = vsub.f32 1.0, %v1142_v39  ;;  %v322_v50 = vmul.f32 %v1123_v18, %v272_v24  ;;  %v1293_v32 = vld [vmem:[%s1687_s3 + $0x88] sm:$0xff]   ;;  %v1301_v40 = vld [vmem:[%s1687_s3 + $0x18] sm:$0xff]  }
  0xdc   : > { %437 = vrot.lane.b32.xlu1 %v420_v37, %s1337_s9  ;;  %v367_v46 = vmul.f32 %v366_v42, %v321_v17  ;;  %v407_v52 = vmul.f32 %v1141_v11, %v364_v38  ;;  %v369_v53 = vmul.f32 %v1133_v29, %v321_v17  ;;  %v1143_v54 = vadd.f32 -0.8333333, %v1417_v26  ;;  %v1297_v36 = vld [vmem:[%s1687_s3 + $0x8] sm:$0xff]   ;;  %v1298_v37 = vld [vmem:[%s1687_s3 + $0x50] sm:$0xff]   ;;  %v1302_v17 = vld [vmem:[%s1687_s3 + $0x60] sm:$0xff]   ;;  %s192_s9 = scalar_lea.vmem %s1688_s4, %s1098_s17 }
  0xdd   : > { %v406_v48 = vadd.f32 %v405_v27, %v403_v33  ;;  %v324_v51 = vmul.f32 %v323_v44, %v273_v43  ;;  %v370_v57 = vsub.f32 1.0, %v1134_v45  ;;  %v504_v25 = vsel %vm502_vm13, %v1291_v47, 0  ;;  %v1294_v33 = vld [vmem:[%s1687_s3 + $0x40] sm:$0xff]   ;;  %v1299_v38 = vld [vmem:[%s1687_s3 + $0x10] sm:$0xff]   ;;  %v1304_v42 = vld [vmem:[%s1687_s3 + $0x68] sm:$0xff]  }
  0xde   : > { %v368_v10 = vadd.f32 %v367_v46, %v365_v41  ;;  %1254 = vmatpush3.bf16.msra.mxu0 %v504_v25  ;;  %v412_v26 = vsub.f32 1.0, %v1143_v54  ;;  %v1101_v4 = vmul.f32 -1.442695, %v1390_v9  ;;  %vm454_vm1 = vcmask 195584   ;;  %1220 = vmatprep.subr.bf16.mxu1 %v1294_v33  ;;  %v1303_v41 = vld [vmem:[%s1687_s3 + $0x20] sm:$0xff]   ;;  %v1305_v27 = vld [vmem:[%s1687_s3 + $0x28] sm:$0xff]  }
  0xdf   : > { %v421_v55 = vpack.c.bf16 %v406_v48, %v406_v48  ;;  %v325_v56 = vadd.f32 %v324_v51, %v322_v50  ;;  %1259 = vmatprep.subr.bf16.mxu0 %v1332_v3  ;;  %vm457_vm2 = vcmask 261120   ;;  %vm460_vm3 = vcmask 326656   ;;  %1221 = vmatpush3.bf16.msra.mxu1 %v1295_v34 }
  0xe0   : > { %v409_v58 = vmul.f32 %v408_v49, %v368_v10  ;;  %v411_v62 = vmul.f32 %v1142_v39, %v368_v10  ;;  %1312 = vpow2.f32 %v1101_v4  ;;  %vm463_vm4 = vcmask 392192   ;;  %1222 = vmatprep.subr.bf16.mxu1 %v1296_v35  ;;  %v1300_v39 = vld [vmem:[%s1687_s3 + $0x58] sm:$0xff]  }
  0xe1   : > { %440 = vrot.lane.b32.xlu1 %v421_v55, %s1338_s12  ;;  %v371_v59 = vmul.f32 %v370_v57, %v325_v56  ;;  %vm466_vm5 = vcmask 457728   ;;  %vm469_vm6 = vcmask 523264   ;;  %vm499_vm7 = vcmask 588800  }
  0xe2   : > { %v410_v60 = vadd.f32 %v409_v58, %v407_v52 }
  0xe3   : > { %v372_v61 = vadd.f32 %v371_v59, %v369_v53  ;;  %1223 = vmatpush3.bf16.msra.mxu1 %v1297_v36 }
  0xe4   : > { %v422_v63 = vpack.c.bf16 %v410_v60, %v410_v60  ;;  %1224 = vmatprep.subr.bf16.mxu1 %v1298_v37 }
  0xe5   : > { %v413_v0 = vmul.f32 %v412_v26, %v372_v61 }
  0xe6   : > { %443 = vrot.lane.b32.xlu1 %v422_v63, %s1340_s13 }
  0xe7   : > { %v414_v1 = vadd.f32 %v413_v0, %v411_v62  ;;  %1225 = vmatpush3.bf16.msra.mxu1 %v1299_v38  ;;  %v1342_v0 = vmov -1.0  }
  0xe8   : > { %1226 = vmatprep.subr.bf16.mxu1 %v1300_v39 }
  0xe9   : > { %v423_v2 = vpack.c.bf16 %v414_v1, %v414_v1 }
  0xea   : > { %v1313_v5 = vpop.eup %1312 }
  0xeb   : > { %446 = vrot.lane.b32.xlu1 %v423_v2, %s1341_s14  ;;  %v223_v7 = vadd.f32 1.0, %v1313_v5  ;;  %1227 = vmatpush3.bf16.msra.mxu1 %v1301_v40 }
  0xec   : > { %1228 = vmatprep.subr.bf16.mxu1 %v1302_v17 }
  0xed   : > { %1314 = vrcp.f32 %v223_v7 }
  0xef   : > { %1229 = vmatpush3.bf16.msra.mxu1 %v1303_v41 }
  0xf0   : > { %1230 = vmatprep.subr.bf16.mxu1 %v1304_v42 }
  0xf3   : > { %1231 = vmatpush3.bf16.msra.mxu1 %v1305_v27 }
  0xf7   : > { %v1315_v12 = vpop.eup %1314 }
  0xf8   : > { %v226_v14 = vmul.f32 %v1315_v12, %v1390_v9 }
  0xfa   : > { %v415_v16 = vpack.c.bf16 %v226_v14, %v226_v14 }
 0x13c   : > { %v429_v6 = vpop.permute.xlu1 %428 }
 0x142   : > { %v426_v15 = vpop.permute.xlu0 %425 }
 0x143   : > { %v450_v19 = vsel %vm197_vm0, %v415_v16, %v426_v15 }
 0x144   : > { %v453_v20 = vsel %vm451_vm15, %v450_v19, %v429_v6 }
 0x145   : > { %v432_v8 = vpop.permute.xlu1 %431 }
 0x146   : > { %v456_v22 = vsel %vm454_vm1, %v453_v20, %v432_v8 }
 0x14a   : > { %v435_v11 = vpop.permute.xlu1 %434 }
 0x14b   : > { %v459_v23 = vsel %vm457_vm2, %v456_v22, %v435_v11 }
 0x14e   : > { %v438_v13 = vpop.permute.xlu1 %437 }
 0x14f   : > { %v462_v24 = vsel %vm460_vm3, %v459_v23, %v438_v13 }
 0x153   : > { %v441_v18 = vpop.permute.xlu1 %440 }
 0x154   : > { %v465_v28 = vsel %vm463_vm4, %v462_v24, %v441_v18 }
 0x158   : > { %v444_v21 = vpop.permute.xlu1 %443 }
 0x159   : > { %v468_v9 = vsel %vm466_vm5, %v465_v28, %v444_v21 }
 0x15d   : > { %v447_v29 = vpop.permute.xlu1 %446 }
 0x15e   : > { %v471_v30 = vsel %vm469_vm6, %v468_v9, %v447_v29 }
 0x15f   : > { %1256 = vmatmul.mubr.msk.bf16.vlgmr.msra.gmra.mrb[0].mxu0 %vm499_vm7, %v471_v30 }
 0x160   : > { %1263 = vmatprep.mubr.msk.bf16.mxu0 %vm1339_vm14, %v1332_v3  ;;  %1260 = vmatpush3.bf16.msra.mxu0 %v1292_v31 }
 0x161   : > { %1261 = vmatprep.subr.bf16.mxu0 %v1332_v3 }
 0x164   : > { %1262 = vmatpush3.bf16.msra.mxu0 %v1293_v32 }
 0x232   : > { %v540_v43 = vpop.f32.mrb[0].mxu0 }
 0x233   : > { %v547_v44 = vmul.f32 0.70710677, %v540_v43  ;;  %v1257_v45 = vpop.f32.mrb[1].mxu0  ;;  %v546_v4 = vmul.f32 0.5, %v540_v43 }
 0x234   : > { %v543_v46 = vpop.f32.mrb[2].mxu0 }
 0x235   : > { %v550_v47 = vand.u32 2147483647, %v547_v44  ;;  %v1258_v48 = vpop.f32.mrb[3].mxu0  ;;  %vm548_vm8 = vcmp.ge.f32.partialorder %v547_v44, 0.0 }
 0x236   : > { %v549_v1 = vsel %vm548_vm8, 1.0, %v1342_v0  ;;  %vm836_vm8 = vcmask 785408  }
 0x237   : > { %v551_v49 = vmul.f32 0.3275911, %v550_v47  ;;  %v564_v51 = vsub.f32 0.0, %v550_v47 }
 0x239   : > { %v552_v50 = vadd.f32 1.0, %v551_v49  ;;  %v565_v52 = vmul.f32 %v564_v51, %v550_v47 }
 0x23b   : > { %1316 = vrcp.f32 %v552_v50  ;;  %v566_v55 = vmul.f32 1.442695, %v565_v52 }
 0x23d   : > { %1318 = vpow2.f32 %v566_v55 }
 0x245   : > { %v1317_v10 = vpop.eup %1316 }
 0x246   : > { %v555_v53 = vmul.f32 1.0614054, %v1317_v10 }
 0x247   : > { %v1319_v62 = vpop.eup %1318 }
 0x248   : > { %v556_v54 = vadd.f32 -1.4531521, %v555_v53 }
 0x24a   : > { %v557_v56 = vmul.f32 %v1317_v10, %v556_v54 }
 0x24c   : > { %v558_v57 = vadd.f32 1.4214138, %v557_v56 }
 0x24e   : > { %v559_v58 = vmul.f32 %v1317_v10, %v558_v57 }
 0x250   : > { %v560_v25 = vadd.f32 -0.28449672, %v559_v58 }
 0x252   : > { %v561_v59 = vmul.f32 %v1317_v10, %v560_v25 }
 0x254   : > { %v562_v60 = vadd.f32 0.2548296, %v561_v59 }
 0x256   : > { %v563_v61 = vmul.f32 %v1317_v10, %v562_v60 }
 0x258   : > { %v568_v26 = vmul.f32 %v1319_v62, %v563_v61 }
 0x25a   : > { %v569_v63 = vsub.f32 1.0, %v568_v26 }
 0x25c   : > { %v570_v2 = vmul.f32 %v569_v63, %v549_v1 }
 0x25e   : > { %v571_v5 = vadd.f32 1.0, %v570_v2 }
 0x260   : > { %v1537_v6 = vmul.f32 %v571_v5, %v546_v4 }
 0x262   : > { %vm637_vm9 = vcmp.ge.f32.partialorder %v1537_v6, 0.6  ;;  %vm640_vm10 = vcmp.ge.f32.partialorder %v1537_v6, 1.0  ;;  %vm643_vm11 = vcmp.ge.f32.partialorder %v1537_v6, 1.4  ;;  %v1543_v7 = vmul.f32 2.5, %v1537_v6 }
 0x263   : > { %v1158_v8 = vsel %vm637_vm9, 1.0, %v1332_v3  ;;  %v1159_v11 = vsel %vm640_vm10, 1.0, %v1332_v3  ;;  %v1160_v12 = vsel %vm643_vm11, 1.0, %v1332_v3  ;;  %vm646_vm12 = vcmp.ge.f32.partialorder %v1537_v6, 1.8 }
 0x264   : > { %v1161_v13 = vsel %vm646_vm12, 1.0, %v1332_v3  ;;  %vm649_vm13 = vcmp.ge.f32.partialorder %v1537_v6, 2.2  ;;  %v659_v14 = vsub.f32 %v1158_v8, %v1159_v11  ;;  %v660_v15 = vsub.f32 %v1159_v11, %v1160_v12 }
 0x265   : > { %v1162_v16 = vsel %vm649_vm13, 1.0, %v1332_v3  ;;  %v661_v18 = vsub.f32 %v1160_v12, %v1161_v13  ;;  %v1170_v19 = vadd.f32 -1.5, %v1543_v7  ;;  %v1171_v20 = vadd.f32 -2.5, %v1543_v7 }
 0x266   : > { %v662_v21 = vsub.f32 %v1161_v13, %v1162_v16  ;;  %v1172_v22 = vadd.f32 -3.5, %v1543_v7  ;;  %v1173_v23 = vadd.f32 -4.5, %v1543_v7  ;;  %v1557_v24 = vmul.f32 1.25, %v1537_v6 }
 0x267   : > { %v703_v28 = vmul.f32 %v1170_v19, %v659_v14  ;;  %v704_v9 = vsub.f32 1.0, %v1171_v20  ;;  %v707_v29 = vmul.f32 %v1171_v20, %v660_v15  ;;  %v1560_v30 = vmul.f32 0.8333333, %v1537_v6 }
 0x268   : > { %v708_v31 = vsub.f32 1.0, %v1172_v22  ;;  %v711_v32 = vmul.f32 %v1172_v22, %v661_v18  ;;  %v712_v33 = vsub.f32 1.0, %v1173_v23  ;;  %v1563_v34 = vadd.f32 -0.75, %v1557_v24 }
 0x269   : > { %v705_v35 = vmul.f32 %v704_v9, %v660_v15  ;;  %v1182_v36 = vadd.f32 -1.25, %v1557_v24  ;;  %v1183_v37 = vadd.f32 -1.75, %v1557_v24  ;;  %v1568_v38 = vadd.f32 -0.5, %v1560_v30 }
 0x26a   : > { %v709_v39 = vmul.f32 %v708_v31, %v661_v18  ;;  %v713_v40 = vmul.f32 %v712_v33, %v662_v21  ;;  %v1192_v17 = vadd.f32 -0.8333333, %v1560_v30  ;;  %vm628_vm14 = vcmp.ge.f32.partialorder %v1537_v6, -0.6 }
 0x26b   : > { %v1572_v41 = vadd.f32 %v705_v35, %v703_v28  ;;  %v755_v42 = vsub.f32 1.0, %v1182_v36  ;;  %v759_v27 = vsub.f32 1.0, %v1183_v37  ;;  %v1575_v43 = vsel %vm628_vm14, 1.0, %v1332_v3 }
 0x26c   : > { %v710_v44 = vadd.f32 %v709_v39, %v707_v29  ;;  %v714_v45 = vadd.f32 %v713_v40, %v711_v32  ;;  %v801_v46 = vsub.f32 1.0, %v1192_v17  ;;  %vm631_vm15 = vcmp.ge.f32.partialorder %v1537_v6, -0.2 }
 0x26d   : > { %v754_v47 = vmul.f32 %v1563_v34, %v1572_v41  ;;  %v1156_v48 = vsel %vm631_vm15, 1.0, %v1332_v3  ;;  %vm634_vm1 = vcmp.ge.f32.partialorder %v1537_v6, 0.2  ;;  %v1583_v49 = vadd.f32 1.5, %v1543_v7 }
 0x26e   : > { %v756_v50 = vmul.f32 %v755_v42, %v710_v44  ;;  %v758_v51 = vmul.f32 %v1182_v36, %v710_v44  ;;  %v760_v10 = vmul.f32 %v759_v27, %v714_v45  ;;  %v1157_v52 = vsel %vm634_vm1, 1.0, %v1332_v3 }
 0x26f   : > { %v1587_v53 = vsub.f32 %v1575_v43, %v1156_v48  ;;  %v657_v54 = vsub.f32 %v1156_v48, %v1157_v52  ;;  %v658_v55 = vsub.f32 %v1157_v52, %v1158_v8  ;;  %v1168_v56 = vadd.f32 0.5, %v1543_v7 }
 0x270   : > { %v1590_v57 = vadd.f32 %v756_v50, %v754_v47  ;;  %v761_v58 = vadd.f32 %v760_v10, %v758_v51  ;;  %v1169_v25 = vadd.f32 -0.5, %v1543_v7  ;;  %v700_v59 = vsub.f32 1.0, %v1170_v19 }
 0x271   : > { %v691_v60 = vmul.f32 %v1583_v49, %v1587_v53  ;;  %v692_v61 = vsub.f32 1.0, %v1168_v56  ;;  %v695_v62 = vmul.f32 %v1168_v56, %v657_v54  ;;  %v1179_v5 = vadd.f32 0.25, %v1557_v24 }
 0x272   : > { %v800_v26 = vmul.f32 %v1568_v38, %v1590_v57  ;;  %v802_v63 = vmul.f32 %v801_v46, %v761_v58  ;;  %v696_v0 = vsub.f32 1.0, %v1169_v25  ;;  %v699_v1 = vmul.f32 %v1169_v25, %v658_v55 }
 0x273   : > { %v693_v2 = vmul.f32 %v692_v61, %v657_v54  ;;  %v701_v4 = vmul.f32 %v700_v59, %v659_v14  ;;  %v1180_v8 = vadd.f32 -0.25, %v1557_v24  ;;  %v1600_v13 = vadd.f32 0.75, %v1557_v24 }
 0x274   : > { %v803_v11 = vadd.f32 %v802_v63, %v800_v26  ;;  %v697_v12 = vmul.f32 %v696_v0, %v658_v55  ;;  %v1603_v15 = vadd.f32 0.16666667, %v1560_v30  ;;  %v1608_v20 = vadd.f32 0.5, %v1560_v30 }
 0x275   : > { %v1605_v16 = vadd.f32 %v693_v2, %v691_v60  ;;  %v702_v18 = vadd.f32 %v701_v4, %v699_v1  ;;  %v747_v19 = vsub.f32 1.0, %v1180_v8  ;;  %v743_v22 = vsub.f32 1.0, %v1179_v5  ;;  %v1306_v2 = vld [vmem:[%s1687_s3 + $0x70] sm:$0xff]  }
 0x276   : > { %v812_v14 = vpack.c.bf16 %v803_v11, %v803_v11  ;;  %v698_v21 = vadd.f32 %v697_v12, %v695_v62  ;;  %v789_v23 = vsub.f32 1.0, %v1603_v15  ;;  %vm616_vm3 = vcmp.ge.f32.partialorder %v1537_v6, -2.2  ;;  %v1307_v4 = vld [vmem:[%s1687_s3 + $0x30] sm:$0xff]   ;;  %1232 = vmatprep.subr.bf16.mxu1 %v1306_v2 }
 0x277   : > { %v742_v28 = vmul.f32 %v1600_v13, %v1605_v16  ;;  %v748_v9 = vmul.f32 %v747_v19, %v702_v18  ;;  %vm619_vm4 = vcmp.ge.f32.partialorder %v1537_v6, -1.8  ;;  %v1151_v32 = vsel %vm616_vm3, 1.0, %v1332_v3  ;;  %1233 = vmatpush3.bf16.msra.mxu1 %v1307_v4 }
 0x278   : > { %1264 = vmatmul.mubr.msk.bf16.vlgmr.msra.gmra.mrb[4].mxu0 %vm457_vm2, %v812_v14  ;;  %v744_v29 = vmul.f32 %v743_v22, %v698_v21  ;;  %v746_v31 = vmul.f32 %v1179_v5, %v698_v21  ;;  %v1152_v33 = vsel %vm619_vm4, 1.0, %v1332_v3  ;;  %vm622_vm5 = vcmp.ge.f32.partialorder %v1537_v6, -1.4 }
 0x279   : > { %vm625_vm7 = vcmp.ge.f32.partialorder %v1537_v6, -1.0  ;;  %v652_v35 = vsub.f32 %v1151_v32, %v1152_v33  ;;  %v1163_v36 = vadd.f32 5.5, %v1543_v7  ;;  %v1153_v40 = vsel %vm622_vm5, 1.0, %v1332_v3 }
 0x27a   : > { %v1621_v37 = vadd.f32 %v744_v29, %v742_v28  ;;  %v749_v39 = vadd.f32 %v748_v9, %v746_v31  ;;  %v1154_v17 = vsel %vm625_vm7, 1.0, %v1332_v3  ;;  %v653_v42 = vsub.f32 %v1152_v33, %v1153_v40 }
 0x27b   : > { %v654_v27 = vsub.f32 %v1153_v40, %v1154_v17  ;;  %v1164_v44 = vadd.f32 4.5, %v1543_v7  ;;  %v1165_v47 = vadd.f32 3.5, %v1543_v7  ;;  %v1166_v48 = vadd.f32 2.5, %v1543_v7 }
 0x27c   : > { %v788_v45 = vmul.f32 %v1608_v20, %v1621_v37  ;;  %v790_v46 = vmul.f32 %v789_v23, %v749_v39  ;;  %v785_v50 = vsub.f32 1.0, %v1608_v20  ;;  %v655_v51 = vsub.f32 %v1154_v17, %v1575_v43 }
 0x27d   : > { %v675_v10 = vmul.f32 %v1163_v36, %v652_v35  ;;  %v676_v52 = vsub.f32 1.0, %v1164_v44  ;;  %v679_v3 = vmul.f32 %v1164_v44, %v653_v42  ;;  %v680_v55 = vsub.f32 1.0, %v1165_v47 }
 0x27e   : > { %v791_v54 = vadd.f32 %v790_v46, %v788_v45  ;;  %v684_v56 = vsub.f32 1.0, %v1166_v48  ;;  %v683_v25 = vmul.f32 %v1165_v47, %v654_v27  ;;  %v1175_v59 = vadd.f32 2.25, %v1557_v24 }
 0x27f   : > { %v677_v58 = vmul.f32 %v676_v52, %v653_v42  ;;  %v1176_v60 = vadd.f32 1.75, %v1557_v24  ;;  %v681_v62 = vmul.f32 %v680_v55, %v654_v27  ;;  %v1185_v7 = vadd.f32 1.5, %v1560_v30 }
 0x280   : > { %v809_v61 = vpack.c.bf16 %v791_v54, %v791_v54  ;;  %v685_v26 = vmul.f32 %v684_v56, %v655_v51  ;;  %v1174_v43 = vadd.f32 2.75, %v1557_v24  ;;  %v727_v0 = vsub.f32 1.0, %v1175_v59 }
 0x281   : > { %v678_v63 = vadd.f32 %v677_v58, %v675_v10  ;;  %v731_v1 = vsub.f32 1.0, %v1176_v60  ;;  %v682_v5 = vadd.f32 %v681_v62, %v679_v3  ;;  %v750_v12 = vmul.f32 %v1180_v8, %v702_v18 }
 0x282   : > { %823 = vrot.lane.b32.xlu0 %v809_v61, %s1336_s8  ;;  %v686_v11 = vadd.f32 %v685_v26, %v683_v25  ;;  %v751_v19 = vsub.f32 1.0, %v1563_v34  ;;  %v1184_v21 = vadd.f32 1.8333334, %v1560_v30  ;;  %v773_v22 = vsub.f32 1.0, %v1185_v7 }
 0x283   : > { %v726_v14 = vmul.f32 %v1174_v43, %v678_v63  ;;  %v1190_v23 = vadd.f32 -0.16666667, %v1560_v30  ;;  %v728_v28 = vmul.f32 %v727_v0, %v682_v5  ;;  %v730_v9 = vmul.f32 %v1175_v59, %v682_v5 }
 0x284   : > { %v732_v29 = vmul.f32 %v731_v1, %v686_v11  ;;  %v752_v31 = vmul.f32 %v751_v19, %v1572_v41  ;;  %v792_v32 = vmul.f32 %v1603_v15, %v749_v39  ;;  %v687_v33 = vmul.f32 %v1166_v48, %v655_v51 }
 0x285   : > { %v688_v8 = vsub.f32 1.0, %v1583_v49  ;;  %v1177_v34 = vadd.f32 1.25, %v1557_v24  ;;  %v729_v18 = vadd.f32 %v728_v28, %v726_v14  ;;  %v793_v40 = vsub.f32 1.0, %v1190_v23  ;;  %v1308_v24 = vld [vmem:[%s1687_s3 + $0x78] sm:$0xff]  }
 0x286   : > { %v733_v35 = vadd.f32 %v732_v29, %v730_v9  ;;  %v753_v36 = vadd.f32 %v752_v31, %v750_v12  ;;  %v734_v42 = vmul.f32 %v1176_v60, %v686_v11  ;;  %v1186_v27 = vadd.f32 1.1666666, %v1560_v30  ;;  %v1309_v49 = vld [vmem:[%s1687_s3 + $0x38] sm:$0xff]   ;;  %1234 = vmatprep.subr.bf16.mxu1 %v1308_v24 }
 0x287   : > { %v689_v17 = vmul.f32 %v688_v8, %v1587_v53  ;;  %v797_v44 = vsub.f32 1.0, %v1568_v38  ;;  %v772_v41 = vmul.f32 %v1184_v21, %v729_v18  ;;  %v739_v15 = vsub.f32 1.0, %v1600_v13  ;;  %1235 = vmatpush3.bf16.msra.mxu1 %v1309_v49 }
 0x288   : > { %v774_v45 = vmul.f32 %v773_v22, %v733_v35  ;;  %v794_v46 = vmul.f32 %v793_v40, %v753_v36  ;;  %v735_v53 = vsub.f32 1.0, %v1177_v34  ;;  %v796_v47 = vmul.f32 %v1190_v23, %v753_v36 }
 0x289   : > { %v690_v39 = vadd.f32 %v689_v17, %v687_v33  ;;  %v798_v48 = vmul.f32 %v797_v44, %v1590_v57  ;;  %v740_v10 = vmul.f32 %v739_v15, %v1605_v16  ;;  %v1187_v52 = vadd.f32 0.8333333, %v1560_v30 }
 0x28a   : > { %v775_v51 = vadd.f32 %v774_v45, %v772_v41  ;;  %v795_v38 = vadd.f32 %v794_v46, %v792_v32  ;;  %v786_v3 = vmul.f32 %v785_v50, %v1621_v37  ;;  %v776_v58 = vmul.f32 %v1185_v7, %v733_v35 }
 0x28b   : > { %v736_v13 = vmul.f32 %v735_v53, %v690_v39  ;;  %v738_v54 = vmul.f32 %v1177_v34, %v690_v39  ;;  %v799_v25 = vadd.f32 %v798_v48, %v796_v47  ;;  %v777_v57 = vsub.f32 1.0, %v1186_v27 }
 0x28c   : > { %v805_v55 = vpack.c.bf16 %v775_v51, %v775_v51  ;;  %v810_v56 = vpack.c.bf16 %v795_v38, %v795_v38  ;;  %v781_v61 = vsub.f32 1.0, %v1187_v52  ;;  %v1150_v0 = vmul.f32 -1.442695, %v1537_v6 }
 0x28d   : > { %v737_v59 = vadd.f32 %v736_v13, %v734_v42  ;;  %v741_v60 = vadd.f32 %v740_v10, %v738_v54  ;;  %v811_v63 = vpack.c.bf16 %v799_v25, %v799_v25 }
 0x28e   : > { %814 = vrot.lane.b32.xlu1 %v805_v55, %s1336_s8  ;;  %826 = vrot.lane.b32.xlu0 %v810_v56, %s1341_s14  ;;  %1320 = vpow2.f32 %v1150_v0 }
 0x28f   : > { %v778_v30 = vmul.f32 %v777_v57, %v737_v59  ;;  %v780_v16 = vmul.f32 %v1186_v27, %v737_v59  ;;  %v782_v62 = vmul.f32 %v781_v61, %v741_v60  ;;  %v784_v26 = vmul.f32 %v1187_v52, %v741_v60 }
 0x291   : > { %v779_v20 = vadd.f32 %v778_v30, %v776_v58  ;;  %v787_v37 = vadd.f32 %v786_v3, %v784_v26  ;;  %v783_v7 = vadd.f32 %v782_v62, %v780_v16 }
 0x292   : > { %829 = vrot.lane.b32.xlu0 %v811_v63, %s1343_s7 }
 0x293   : > { %v806_v50 = vpack.c.bf16 %v779_v20, %v779_v20  ;;  %v807_v43 = vpack.c.bf16 %v783_v7, %v783_v7  ;;  %v808_v12 = vpack.c.bf16 %v787_v37, %v787_v37 }
 0x295   : > { %817 = vrot.lane.b32.xlu1 %v806_v50, %s1341_s14 }
 0x298   : > { %v1321_v1 = vpop.eup %1320 }
 0x299   : > { %820 = vrot.lane.b32.xlu1 %v807_v43, %s1343_s7  ;;  %v612_v2 = vadd.f32 1.0, %v1321_v1 }
 0x29b   : > { %1322 = vrcp.f32 %v612_v2 }
 0x2a5   : > { %v1323_v11 = vpop.eup %1322 }
 0x2a6   : > { %v615_v21 = vmul.f32 %v1323_v11, %v1537_v6 }
 0x2a8   : > { %v804_v29 = vpack.c.bf16 %v615_v21, %v615_v21 }
 0x2f4   : > { %v824_v4 = vpop.permute.xlu0 %823 }
 0x2f5   : > { %v842_v14 = vsel %vm457_vm2, %v808_v12, %v824_v4 }
 0x300   : > { %v827_v5 = vpop.permute.xlu0 %826  ;;  %v815_v19 = vpop.permute.xlu1 %814 }
 0x301   : > { %v844_v22 = vsel %vm469_vm6, %v842_v14, %v827_v5  ;;  %v833_v31 = vsel %vm457_vm2, %v804_v29, %v815_v19 }
 0x304   : > { %v830_v23 = vpop.permute.xlu0 %829 }
 0x305   : > { %v846_v28 = vsel %vm836_vm8, %v844_v22, %v830_v23 }
 0x306   : > { %991 = vmatprep.mubr.bf16.mxu1 %v846_v28 }
 0x307   : > { %v818_v9 = vpop.permute.xlu1 %817 }
 0x308   : > { %v835_v32 = vsel %vm469_vm6, %v833_v31, %v818_v9 }
 0x30b   : > { %v821_v33 = vpop.permute.xlu1 %820 }
 0x30c   : > { %v838_v8 = vsel %vm836_vm8, %v835_v32, %v821_v33 }
 0x30d   : > { %992 = vmatmul.mubr.bf16.vlgmr.msra.gmra.mrb[0].mxu1 %v838_v8 }
 0x34b   : > { %v1033_v34 = vpop.f32.mrb[4].mxu0 }
 0x34c   : > { %v1265_v18 = vpop.f32.mrb[5].mxu0 }
 0x34d   : > { %v1036_v35 = vpop.f32.mrb[6].mxu0 }
 0x34e   : > { %v1266_v36 = vpop.f32.mrb[7].mxu0 }
 0x3e0   : > { %v1236_v6 = vpop.f32.mrb[0].mxu1 }
 0x3e1   : > { %v1237_v40 = vpop.f32.mrb[1].mxu1 }
 0x3e2   : > { %v1238_v17 = vadd.f32 %v1237_v40, %v1236_v6  ;;  %v1239_v42 = vpop.f32.mrb[2].mxu1 }
 0x3e3   : > { %v1240_v27 = vpop.f32.mrb[3].mxu1 }
 0x3e4   : > { %v1034_v44 = vadd.f32 %v1238_v17, %v1033_v34 }
 0x3e6   : > { %1039 = vst.msk [vmem:[%s192_s9] sm:$0xff] %vm197_vm0, %v1034_v44 }
 0x3e7 PF: > { %s14_s15 = sadd.s32 1, %s1330_s15  }
 0x3e8   : > { %p11_p4 = scmp.ge.s32.totalorder %s14_s15, 4  }
 0x3ea   :  { %13 = sbr.rel (!%p11_p4) target bundleno = 1 (0x1), region = 66 }

</bundles_post_ra>
